<compile_context>
chip_gen: v7x
topology: tpu7x:2x2x1
jax: 0.10.0
libtpu: 0.0.40
codegen_flags: <defaults>
</compile_context>

<pallas_src>
import functools
import numpy as np

import jax
import jax.numpy as jnp
from jax.experimental import pallas as pl
from jax.experimental.pallas import tpu as pltpu


def _round_up(x, m):
    return (x + m - 1) // m * m


# ----------------------------- Pallas kernels ------------------------------

def _encoder_layer_kernel(x_ref, bias_ref, wqkv_ref, bqkv_ref, wo_ref, bo_ref,
                          ln1g_ref, ln1b_ref, w1_ref, b1_ref, w2_ref, b2_ref,
                          ln2g_ref, ln2b_ref, o_ref, *, num_heads, head_dim, eps):
    """One full post-LN transformer encoder layer for a single batch element."""
    H = num_heads * head_dim
    x = x_ref[0]                                        # (T, H) f32
    xb = x.astype(jnp.bfloat16)

    # Fused QKV projection: (T, H) @ (H, 3H) -> (T, 3H).  1/sqrt(dh) is
    # pre-folded into the Wq / bq slices of wqkv / bqkv by the wrapper.
    qkv = jnp.dot(xb, wqkv_ref[...], preferred_element_type=jnp.float32)
    qkv = qkv + bqkv_ref[...]

    heads = []
    for h in range(num_heads):                           # static unrolled loop
        lo = h * head_dim
        q = qkv[:, lo:lo + head_dim].astype(jnp.bfloat16)            # (T, dh)
        k = qkv[:, H + lo:H + lo + head_dim].astype(jnp.bfloat16)    # (T, dh)
        v = qkv[:, 2 * H + lo:2 * H + lo + head_dim].astype(jnp.bfloat16)
        # Scores: contract the head dim directly (no explicit transpose).
        s = jax.lax.dot_general(q, k, (((1,), (1,)), ((), ())),
                                preferred_element_type=jnp.float32)  # (T, T)
        s = s + bias_ref[0, h]            # rel-pos bias + key-padding (-1e9)
        s = s - jnp.max(s, axis=-1, keepdims=True)
        p = jnp.exp(s)
        p = p * pl.reciprocal(jnp.sum(p, axis=-1, keepdims=True), approx=True)
        heads.append(jnp.dot(p.astype(jnp.bfloat16), v,
                             preferred_element_type=jnp.float32))    # (T, dh)
    attn = jnp.concatenate(heads, axis=-1)               # (T, H) lane-dense

    # Output projection + residual + LayerNorm1.
    attn = jnp.dot(attn.astype(jnp.bfloat16), wo_ref[...],
                   preferred_element_type=jnp.float32) + bo_ref[...]
    y = attn + x
    mean = jnp.mean(y, axis=-1, keepdims=True)
    var = jnp.mean(jnp.square(y - mean), axis=-1, keepdims=True)
    y = (y - mean) * jax.lax.rsqrt(var + eps)
    y = y * ln1g_ref[...] + ln1b_ref[...]

    # FFN (GELU) + residual + LayerNorm2.
    # TODO(synk): PyTorch 'gelu' is exact erf-GELU; tanh approximation used here.
    h1 = jnp.dot(y.astype(jnp.bfloat16), w1_ref[...],
                 preferred_element_type=jnp.float32) + b1_ref[...]
    h1 = jax.nn.gelu(h1, approximate=True)
    h2 = jnp.dot(h1.astype(jnp.bfloat16), w2_ref[...],
                 preferred_element_type=jnp.float32) + b2_ref[...]
    z = h2 + y
    mean = jnp.mean(z, axis=-1, keepdims=True)
    var = jnp.mean(jnp.square(z - mean), axis=-1, keepdims=True)
    z = (z - mean) * jax.lax.rsqrt(var + eps)
    o_ref[0] = (z * ln2g_ref[...] + ln2b_ref[...]).astype(o_ref.dtype)


def encoder_layer(x, attn_bias, lw, *, num_heads, eps=1e-5):
    """x: (B, T, H) f32; attn_bias: (B, nH, T, T) f32 (rel-pos + key-pad)."""
    B, T, H = x.shape
    dh = H // num_heads
    F = lw["w1"].shape[1]

    def full(shape):
        return pl.BlockSpec(shape, lambda b, _s=shape: (0,) * len(_s))

    return pl.pallas_call(
        functools.partial(_encoder_layer_kernel, num_heads=num_heads,
                          head_dim=dh, eps=eps),
        out_shape=jax.ShapeDtypeStruct((B, T, H), jnp.float32),
        grid=(B,),
        in_specs=[
            pl.BlockSpec((1, T, H), lambda b: (b, 0, 0)),
            pl.BlockSpec((1, num_heads, T, T), lambda b: (b, 0, 0, 0)),
            full((H, 3 * H)), full((1, 3 * H)),
            full((H, H)), full((1, H)),
            full((1, H)), full((1, H)),
            full((H, F)), full((1, F)),
            full((F, H)), full((1, H)),
            full((1, H)), full((1, H)),
        ],
        out_specs=pl.BlockSpec((1, T, H), lambda b: (b, 0, 0)),
        compiler_params=pltpu.CompilerParams(
            dimension_semantics=("parallel",)),
    )(x, attn_bias, lw["wqkv"], lw["bqkv"], lw["wo"], lw["bo"],
      lw["ln1_g"], lw["ln1_b"], lw["w1"], lw["b1"], lw["w2"], lw["b2"],
      lw["ln2_g"], lw["ln2_b"])


def _head_kernel(x_ref, w1_ref, b1_ref, w2_ref, b2_ref, o_ref):
    """Fused TokenClassificationHead: Linear -> tanh -> Linear (lane-padded)."""
    x = x_ref[...].astype(jnp.bfloat16)
    h = jnp.dot(x, w1_ref[...], preferred_element_type=jnp.float32) + b1_ref[...]
    h = jnp.tanh(h)
    y = jnp.dot(h.astype(jnp.bfloat16), w2_ref[...],
                preferred_element_type=jnp.float32) + b2_ref[...]
    o_ref[...] = y.astype(o_ref.dtype)


def classification_head(tok, head):
    Lp, _ = tok.shape
    N = head["w2"].shape[1]
    return pl.pallas_call(
        _head_kernel,
        out_shape=jax.ShapeDtypeStruct((Lp, N), jnp.float32),
    )(tok, head["w1"], head["b1"], head["w2"], head["b2"])


# ------------------------------ configuration ------------------------------

CFG = dict(
    morpho_dim_hidden=16,
    stem_dim_hidden=64,
    hidden_dim=16 * 4 + 64,          # 128
    num_heads=4,
    dim_ffn=256,
    num_layers=2,
    num_classes=5,
    max_rel_pos=8,
    tot_num_stems=50,
    tot_num_morphs=30,
    tot_num_pos=20,
    tot_num_affixes=40,
)


# ---------------------------- parameter creation ---------------------------

def init_params(key, cfg):
    md, sd, H = cfg["morpho_dim_hidden"], cfg["stem_dim_hidden"], cfg["hidden_dim"]
    nH, F, C = cfg["num_heads"], cfg["dim_ffn"], cfg["num_classes"]

    ks = iter(jax.random.split(key, 64))

    def nrm(shape, scale=0.02):
        return scale * jax.random.normal(next(ks), shape, jnp.float32)

    params = {}
    params["morpho"] = {
        "stem_emb": nrm((cfg["tot_num_stems"], md)),
        "morph_emb": nrm((cfg["tot_num_morphs"], md)),
        "pos_emb": nrm((cfg["tot_num_pos"], md)),
        "afx_emb": nrm((cfg["tot_num_affixes"], md)),
    }
    # nn.Embedding(..., padding_idx=0) -> zero row 0
    stem_embedding = nrm((cfg["tot_num_stems"], sd))
    params["stem_embedding"] = stem_embedding.at[0].set(0.0)

    # relative-position bias table: (2*max_rel+1, num_heads)
    params["rel_pos_emb"] = nrm((2 * cfg["max_rel_pos"] + 1, nH))

    layers = []
    for _ in range(cfg["num_layers"]):
        layers.append({
            "wq": nrm((H, H)), "bq": jnp.zeros((H,), jnp.float32),
            "wk": nrm((H, H)), "bk": jnp.zeros((H,), jnp.float32),
            "wv": nrm((H, H)), "bv": jnp.zeros((H,), jnp.float32),
            "wo": nrm((H, H)), "bo": jnp.zeros((H,), jnp.float32),
            "ln1_g": jnp.ones((H,), jnp.float32), "ln1_b": jnp.zeros((H,), jnp.float32),
            "w1": nrm((H, F)), "b1": jnp.zeros((F,), jnp.float32),
            "w2": nrm((F, H)), "b2": jnp.zeros((H,), jnp.float32),
            "ln2_g": jnp.ones((H,), jnp.float32), "ln2_b": jnp.zeros((H,), jnp.float32),
        })
    params["layers"] = layers

    inner = C * 8
    params["head"] = {
        "w1": nrm((H, inner)), "b1": jnp.zeros((inner,), jnp.float32),
        "w2": nrm((inner, C)), "b2": jnp.zeros((C,), jnp.float32),
    }
    return params


def prepare_params(params, cfg):
    """Fuse QKV weights, fold the attention scale, cast matmul weights to bf16,
    and lane-pad the classification head to 128-wide tiles."""
    H, nH, C = cfg["hidden_dim"], cfg["num_heads"], cfg["num_classes"]
    dh = H // nH
    scale = 1.0 / float(np.sqrt(dh))

    layers = []
    for lp in params["layers"]:
        wqkv = jnp.concatenate([lp["wq"] * scale, lp["wk"], lp["wv"]], axis=1)
        bqkv = jnp.concatenate([lp["bq"] * scale, lp["bk"], lp["bv"]])
        layers.append({
            "wqkv": wqkv.astype(jnp.bfloat16),
            "bqkv": bqkv.reshape(1, 3 * H).astype(jnp.float32),
            "wo": lp["wo"].astype(jnp.bfloat16),
            "bo": lp["bo"].reshape(1, H),
            "ln1_g": lp["ln1_g"].reshape(1, H), "ln1_b": lp["ln1_b"].reshape(1, H),
            "w1": lp["w1"].astype(jnp.bfloat16), "b1": lp["b1"].reshape(1, -1),
            "w2": lp["w2"].astype(jnp.bfloat16), "b2": lp["b2"].reshape(1, H),
            "ln2_g": lp["ln2_g"].reshape(1, H), "ln2_b": lp["ln2_b"].reshape(1, H),
        })

    inner = params["head"]["w1"].shape[1]
    PAD = 128
    w1p = jnp.zeros((H, PAD), jnp.float32).at[:, :inner].set(params["head"]["w1"])
    b1p = jnp.zeros((1, PAD), jnp.float32).at[0, :inner].set(params["head"]["b1"])
    w2p = jnp.zeros((PAD, PAD), jnp.float32).at[:inner, :C].set(params["head"]["w2"])
    b2p = jnp.zeros((1, PAD), jnp.float32).at[0, :C].set(params["head"]["b2"])
    head = {"w1": w1p.astype(jnp.bfloat16), "b1": b1p,
            "w2": w2p.astype(jnp.bfloat16), "b2": b2p}
    return layers, head


# ------------------------------ forward (glue) ------------------------------

def mybert_sequence_tagger_forward(params, cfg, lm_morphs, pos_tags, affixes,
                                   tokens_lengths, stems, input_sequence_lengths):
    assert int(affixes.shape[0]) == int(sum(tokens_lengths)), "Mismatch token lengths"

    md, H = cfg["morpho_dim_hidden"], cfg["hidden_dim"]
    nH, C = cfg["num_heads"], cfg["num_classes"]
    L = int(stems.shape[0])

    # ---------- MorphoEncoder (simplified, see TODO at top) ----------
    f_stem = params["morpho"]["stem_emb"][stems]          # (L, md)
    f_morph = params["morpho"]["morph_emb"][lm_morphs]    # (L, md)
    f_pos = params["morpho"]["pos_emb"][pos_tags]         # (L, md)
    seg_ids = jnp.asarray(np.repeat(np.arange(L), np.asarray(tokens_lengths)), jnp.int32)
    afx_e = params["morpho"]["afx_emb"][affixes]          # (A, md)
    f_afx = jax.ops.segment_sum(afx_e, seg_ids, num_segments=L)

    # (4, L, md) -> permute(1,0,2) -> view(L, 4*md), matching the torch code
    morpho_input = jnp.stack([f_stem, f_morph, f_pos, f_afx], axis=0)
    morpho_input = jnp.transpose(morpho_input, (1, 0, 2)).reshape(L, 4 * md)

    stem_input = params["stem_embedding"][stems]          # (L, sd)
    input_sequences = jnp.concatenate([morpho_input, stem_input], axis=1)  # (L, H)

    # ---------- pad_sequence -> (B, T, H) via ONE scatter (static indices) ----------
    lengths = [int(l) for l in input_sequence_lengths]
    B = len(lengths)
    T = _round_up(max(lengths), 8)                        # sublane-aligned seq len
    flat_pos = np.concatenate(
        [b * T + np.arange(l) for b, l in enumerate(lengths)]).astype(np.int32)
    x_flat = jnp.zeros((B * T, H), jnp.float32).at[flat_pos].set(input_sequences)
    x = x_flat.reshape(B, T, H)

    key_pad = np.ones((B, T), np.float32)                 # 1.0 = padding
    for b, l in enumerate(lengths):
        key_pad[b, :l] = 0.0

    # ---------- relative-position bias + key-padding mask, pre-combined ----------
    max_rel = cfg["max_rel_pos"]
    pos = np.arange(T)
    rel = np.clip(pos[None, :] - pos[:, None], -max_rel, max_rel) + max_rel   # (T, T)
    bias = params["rel_pos_emb"][jnp.asarray(rel)]                            # (T, T, nH)
    bias = jnp.transpose(bias, (2, 0, 1)).astype(jnp.float32)                 # (nH, T, T)
    attn_bias = bias[None] + jnp.asarray(key_pad)[:, None, None, :] * (-1e9)  # (B,nH,T,T)

    # ---------- TransformerEncoder: ONE fused Pallas call per layer ----------
    layers, head = prepare_params(params, cfg)
    for lw in layers:
        x = encoder_layer(x, attn_bias, lw, num_heads=nH)

    # ---------- unpad via ONE gather, then fused classification head ----------
    hidden_flat = x.reshape(B * T, H)
    tok = hidden_flat[jnp.asarray(flat_pos)]              # (L, H)
    Lp = _round_up(L, 8)
    tok_p = jnp.zeros((Lp, H), jnp.float32).at[:L].set(tok)
    scores = classification_head(tok_p, head)             # (Lp, 128)
    return scores[:L, :C]


# ---------------------------------- main ------------------------------------

if __name__ == "__main__":
    key = jax.random.PRNGKey(0)
    pkey, dkey = jax.random.split(key)
    params = init_params(pkey, CFG)

    # Small, deterministic example inputs.
    input_sequence_lengths = [7, 5]          # B = 2 sequences, L = 12 tokens total
    L = sum(input_sequence_lengths)
    tokens_lengths = [1, 0, 2, 1, 0, 1, 2, 0, 1, 1, 0, 2]   # affix counts per token
    A = sum(tokens_lengths)

    k1, k2, k3, k4 = jax.random.split(dkey, 4)
    stems = jax.random.randint(k1, (L,), 1, CFG["tot_num_stems"], dtype=jnp.int32)
    lm_morphs = jax.random.randint(k2, (L,), 0, CFG["tot_num_morphs"], dtype=jnp.int32)
    pos_tags = jax.random.randint(k3, (L,), 0, CFG["tot_num_pos"], dtype=jnp.int32)
    affixes = jax.random.randint(k4, (A,), 1, CFG["tot_num_affixes"], dtype=jnp.int32)

    out = mybert_sequence_tagger_forward(
        params, CFG, lm_morphs, pos_tags, affixes,
        tokens_lengths, stems, input_sequence_lengths)
    out = jax.block_until_ready(out)
    assert out.shape == (L, CFG["num_classes"]), out.shape
    assert bool(jnp.all(jnp.isfinite(out)))
    print("KERNEL_OK")
</pallas_src>

<mosaic_0001>
module attributes {stable_mosaic.version = 11 : i64} {
  func.func @_encoder_layer_kernel(%arg0: i32, %arg1: memref<1x8x128xf32, #tpu.memory_space<vmem>>, %arg2: memref<1x4x8x8xf32, #tpu.memory_space<vmem>>, %arg3: memref<128x384xbf16, #tpu.memory_space<vmem>>, %arg4: memref<1x384xf32, #tpu.memory_space<vmem>>, %arg5: memref<128x128xbf16, #tpu.memory_space<vmem>>, %arg6: memref<1x128xf32, #tpu.memory_space<vmem>>, %arg7: memref<1x128xf32, #tpu.memory_space<vmem>>, %arg8: memref<1x128xf32, #tpu.memory_space<vmem>>, %arg9: memref<128x256xbf16, #tpu.memory_space<vmem>>, %arg10: memref<1x256xf32, #tpu.memory_space<vmem>>, %arg11: memref<256x128xbf16, #tpu.memory_space<vmem>>, %arg12: memref<1x128xf32, #tpu.memory_space<vmem>>, %arg13: memref<1x128xf32, #tpu.memory_space<vmem>>, %arg14: memref<1x128xf32, #tpu.memory_space<vmem>>, %arg15: memref<1x8x128xf32, #tpu.memory_space<vmem>>) attributes {dimension_semantics = [#tpu.dimension_semantics<parallel>], iteration_bounds = array<i64: 2>, scalar_prefetch = 0 : i64, scratch_operands = 0 : i64, tpu.core_type = #tpu.core_type<tc>, window_params = [{transform_indices = @transform_0, window_bounds = array<i64: 1, 8, 128>}, {transform_indices = @transform_1, window_bounds = array<i64: 1, 4, 8, 8>}, {pipeline_mode = #tpu.pipeline_mode<synchronous>, transform_indices = @transform_2, window_bounds = array<i64: 128, 384>}, {pipeline_mode = #tpu.pipeline_mode<synchronous>, transform_indices = @transform_3, window_bounds = array<i64: 1, 384>}, {pipeline_mode = #tpu.pipeline_mode<synchronous>, transform_indices = @transform_4, window_bounds = array<i64: 128, 128>}, {pipeline_mode = #tpu.pipeline_mode<synchronous>, transform_indices = @transform_5, window_bounds = array<i64: 1, 128>}, {pipeline_mode = #tpu.pipeline_mode<synchronous>, transform_indices = @transform_6, window_bounds = array<i64: 1, 128>}, {pipeline_mode = #tpu.pipeline_mode<synchronous>, transform_indices = @transform_7, window_bounds = array<i64: 1, 128>}, {pipeline_mode = #tpu.pipeline_mode<synchronous>, transform_indices = @transform_8, window_bounds = array<i64: 128, 256>}, {pipeline_mode = #tpu.pipeline_mode<synchronous>, transform_indices = @transform_9, window_bounds = array<i64: 1, 256>}, {pipeline_mode = #tpu.pipeline_mode<synchronous>, transform_indices = @transform_10, window_bounds = array<i64: 256, 128>}, {pipeline_mode = #tpu.pipeline_mode<synchronous>, transform_indices = @transform_11, window_bounds = array<i64: 1, 128>}, {pipeline_mode = #tpu.pipeline_mode<synchronous>, transform_indices = @transform_12, window_bounds = array<i64: 1, 128>}, {pipeline_mode = #tpu.pipeline_mode<synchronous>, transform_indices = @transform_13, window_bounds = array<i64: 1, 128>}, {transform_indices = @transform_14, window_bounds = array<i64: 1, 8, 128>}]} {
    %c0 = arith.constant 0 : index
    %c0_0 = arith.constant 0 : index
    %c0_1 = arith.constant 0 : index
    %0 = vector.load %arg1[%c0, %c0_0, %c0_1] : memref<1x8x128xf32, #tpu.memory_space<vmem>>, vector<1x8x128xf32>
    %1 = vector.shape_cast %0 : vector<1x8x128xf32> to vector<8x128xf32>
    %2 = arith.truncf %1 : vector<8x128xf32> to vector<8x128xbf16>
    %c0_2 = arith.constant 0 : index
    %c0_3 = arith.constant 0 : index
    %3 = vector.load %arg3[%c0_2, %c0_3] : memref<128x384xbf16, #tpu.memory_space<vmem>>, vector<128x384xbf16>
    %cst = arith.constant dense<0.000000e+00> : vector<8x384xf32>
    %4 = tpu.matmul %2, %3, %cst {dimension_numbers = #tpu.dot_dimension_numbers<[1], [0], [0], [1], [0, 0, 1, 1], [], []>} : vector<8x128xbf16>, vector<128x384xbf16>, vector<8x384xf32> -> vector<8x384xf32>
    %c0_4 = arith.constant 0 : index
    %c0_5 = arith.constant 0 : index
    %5 = vector.load %arg4[%c0_4, %c0_5] : memref<1x384xf32, #tpu.memory_space<vmem>>, vector<1x384xf32>
    %6 = vector.broadcast %5 : vector<1x384xf32> to vector<8x384xf32>
    %7 = arith.addf %4, %6 : vector<8x384xf32>
    %8 = vector.extract_strided_slice %7 {offsets = [0, 0], sizes = [8, 32], strides = [1, 1]} : vector<8x384xf32> to vector<8x32xf32>
    %9 = arith.truncf %8 : vector<8x32xf32> to vector<8x32xbf16>
    %10 = vector.extract_strided_slice %7 {offsets = [0, 128], sizes = [8, 32], strides = [1, 1]} : vector<8x384xf32> to vector<8x32xf32>
    %11 = arith.truncf %10 : vector<8x32xf32> to vector<8x32xbf16>
    %12 = vector.extract_strided_slice %7 {offsets = [0, 256], sizes = [8, 32], strides = [1, 1]} : vector<8x384xf32> to vector<8x32xf32>
    %13 = arith.truncf %12 : vector<8x32xf32> to vector<8x32xbf16>
    %cst_6 = arith.constant dense<0.000000e+00> : vector<8x8xf32>
    %14 = tpu.matmul %9, %11, %cst_6 {dimension_numbers = #tpu.dot_dimension_numbers<[1], [1], [0], [0], [0, 0, 1, 0], [], []>} : vector<8x32xbf16>, vector<8x32xbf16>, vector<8x8xf32> -> vector<8x8xf32>
    %c0_7 = arith.constant 0 : index
    %c0_8 = arith.constant 0 : index
    %c0_9 = arith.constant 0 : index
    %c0_10 = arith.constant 0 : index
    %15 = vector.load %arg2[%c0_7, %c0_8, %c0_9, %c0_10] : memref<1x4x8x8xf32, #tpu.memory_space<vmem>>, vector<1x1x8x8xf32>
    %16 = vector.shape_cast %15 : vector<1x1x8x8xf32> to vector<8x8xf32>
    %17 = arith.addf %14, %16 : vector<8x8xf32>
    %cst_11 = arith.constant dense<0xFF800000> : vector<8xf32>
    %18 = vector.multi_reduction <maximumf>, %17, %cst_11 [1] : vector<8x8xf32> to vector<8xf32>
    %19 = vector.shape_cast %18 : vector<8xf32> to vector<8x1xf32>
    %20 = vector.broadcast %19 : vector<8x1xf32> to vector<8x8xf32>
    %21 = arith.subf %17, %20 : vector<8x8xf32>
    %22 = math.exp %21 : vector<8x8xf32>
    %cst_12 = arith.constant dense<0.000000e+00> : vector<8xf32>
    %23 = vector.multi_reduction <add>, %22, %cst_12 [1] : vector<8x8xf32> to vector<8xf32>
    %24 = vector.shape_cast %23 : vector<8xf32> to vector<8x1xf32>
    %25 = tpu.reciprocal %24 {approx = true} : vector<8x1xf32> -> vector<8x1xf32>
    %26 = vector.broadcast %25 : vector<8x1xf32> to vector<8x8xf32>
    %27 = arith.mulf %22, %26 : vector<8x8xf32>
    %28 = arith.truncf %27 : vector<8x8xf32> to vector<8x8xbf16>
    %cst_13 = arith.constant dense<0.000000e+00> : vector<8x32xf32>
    %29 = tpu.matmul %28, %13, %cst_13 {dimension_numbers = #tpu.dot_dimension_numbers<[1], [0], [0], [1], [0, 0, 1, 1], [], []>} : vector<8x8xbf16>, vector<8x32xbf16>, vector<8x32xf32> -> vector<8x32xf32>
    %30 = vector.extract_strided_slice %7 {offsets = [0, 32], sizes = [8, 32], strides = [1, 1]} : vector<8x384xf32> to vector<8x32xf32>
    %31 = arith.truncf %30 : vector<8x32xf32> to vector<8x32xbf16>
    %32 = vector.extract_strided_slice %7 {offsets = [0, 160], sizes = [8, 32], strides = [1, 1]} : vector<8x384xf32> to vector<8x32xf32>
    %33 = arith.truncf %32 : vector<8x32xf32> to vector<8x32xbf16>
    %34 = vector.extract_strided_slice %7 {offsets = [0, 288], sizes = [8, 32], strides = [1, 1]} : vector<8x384xf32> to vector<8x32xf32>
    %35 = arith.truncf %34 : vector<8x32xf32> to vector<8x32xbf16>
    %cst_14 = arith.constant dense<0.000000e+00> : vector<8x8xf32>
    %36 = tpu.matmul %31, %33, %cst_14 {dimension_numbers = #tpu.dot_dimension_numbers<[1], [1], [0], [0], [0, 0, 1, 0], [], []>} : vector<8x32xbf16>, vector<8x32xbf16>, vector<8x8xf32> -> vector<8x8xf32>
    %c0_15 = arith.constant 0 : index
    %c1 = arith.constant 1 : index
    %c0_16 = arith.constant 0 : index
    %c0_17 = arith.constant 0 : index
    %37 = vector.load %arg2[%c0_15, %c1, %c0_16, %c0_17] : memref<1x4x8x8xf32, #tpu.memory_space<vmem>>, vector<1x1x8x8xf32>
    %38 = vector.shape_cast %37 : vector<1x1x8x8xf32> to vector<8x8xf32>
    %39 = arith.addf %36, %38 : vector<8x8xf32>
    %cst_18 = arith.constant dense<0xFF800000> : vector<8xf32>
    %40 = vector.multi_reduction <maximumf>, %39, %cst_18 [1] : vector<8x8xf32> to vector<8xf32>
    %41 = vector.shape_cast %40 : vector<8xf32> to vector<8x1xf32>
    %42 = vector.broadcast %41 : vector<8x1xf32> to vector<8x8xf32>
    %43 = arith.subf %39, %42 : vector<8x8xf32>
    %44 = math.exp %43 : vector<8x8xf32>
    %cst_19 = arith.constant dense<0.000000e+00> : vector<8xf32>
    %45 = vector.multi_reduction <add>, %44, %cst_19 [1] : vector<8x8xf32> to vector<8xf32>
    %46 = vector.shape_cast %45 : vector<8xf32> to vector<8x1xf32>
    %47 = tpu.reciprocal %46 {approx = true} : vector<8x1xf32> -> vector<8x1xf32>
    %48 = vector.broadcast %47 : vector<8x1xf32> to vector<8x8xf32>
    %49 = arith.mulf %44, %48 : vector<8x8xf32>
    %50 = arith.truncf %49 : vector<8x8xf32> to vector<8x8xbf16>
    %cst_20 = arith.constant dense<0.000000e+00> : vector<8x32xf32>
    %51 = tpu.matmul %50, %35, %cst_20 {dimension_numbers = #tpu.dot_dimension_numbers<[1], [0], [0], [1], [0, 0, 1, 1], [], []>} : vector<8x8xbf16>, vector<8x32xbf16>, vector<8x32xf32> -> vector<8x32xf32>
    %52 = vector.extract_strided_slice %7 {offsets = [0, 64], sizes = [8, 32], strides = [1, 1]} : vector<8x384xf32> to vector<8x32xf32>
    %53 = arith.truncf %52 : vector<8x32xf32> to vector<8x32xbf16>
    %54 = vector.extract_strided_slice %7 {offsets = [0, 192], sizes = [8, 32], strides = [1, 1]} : vector<8x384xf32> to vector<8x32xf32>
    %55 = arith.truncf %54 : vector<8x32xf32> to vector<8x32xbf16>
    %56 = vector.extract_strided_slice %7 {offsets = [0, 320], sizes = [8, 32], strides = [1, 1]} : vector<8x384xf32> to vector<8x32xf32>
    %57 = arith.truncf %56 : vector<8x32xf32> to vector<8x32xbf16>
    %cst_21 = arith.constant dense<0.000000e+00> : vector<8x8xf32>
    %58 = tpu.matmul %53, %55, %cst_21 {dimension_numbers = #tpu.dot_dimension_numbers<[1], [1], [0], [0], [0, 0, 1, 0], [], []>} : vector<8x32xbf16>, vector<8x32xbf16>, vector<8x8xf32> -> vector<8x8xf32>
    %c0_22 = arith.constant 0 : index
    %c2 = arith.constant 2 : index
    %c0_23 = arith.constant 0 : index
    %c0_24 = arith.constant 0 : index
    %59 = vector.load %arg2[%c0_22, %c2, %c0_23, %c0_24] : memref<1x4x8x8xf32, #tpu.memory_space<vmem>>, vector<1x1x8x8xf32>
    %60 = vector.shape_cast %59 : vector<1x1x8x8xf32> to vector<8x8xf32>
    %61 = arith.addf %58, %60 : vector<8x8xf32>
    %cst_25 = arith.constant dense<0xFF800000> : vector<8xf32>
    %62 = vector.multi_reduction <maximumf>, %61, %cst_25 [1] : vector<8x8xf32> to vector<8xf32>
    %63 = vector.shape_cast %62 : vector<8xf32> to vector<8x1xf32>
    %64 = vector.broadcast %63 : vector<8x1xf32> to vector<8x8xf32>
    %65 = arith.subf %61, %64 : vector<8x8xf32>
    %66 = math.exp %65 : vector<8x8xf32>
    %cst_26 = arith.constant dense<0.000000e+00> : vector<8xf32>
    %67 = vector.multi_reduction <add>, %66, %cst_26 [1] : vector<8x8xf32> to vector<8xf32>
    %68 = vector.shape_cast %67 : vector<8xf32> to vector<8x1xf32>
    %69 = tpu.reciprocal %68 {approx = true} : vector<8x1xf32> -> vector<8x1xf32>
    %70 = vector.broadcast %69 : vector<8x1xf32> to vector<8x8xf32>
    %71 = arith.mulf %66, %70 : vector<8x8xf32>
    %72 = arith.truncf %71 : vector<8x8xf32> to vector<8x8xbf16>
    %cst_27 = arith.constant dense<0.000000e+00> : vector<8x32xf32>
    %73 = tpu.matmul %72, %57, %cst_27 {dimension_numbers = #tpu.dot_dimension_numbers<[1], [0], [0], [1], [0, 0, 1, 1], [], []>} : vector<8x8xbf16>, vector<8x32xbf16>, vector<8x32xf32> -> vector<8x32xf32>
    %74 = vector.extract_strided_slice %7 {offsets = [0, 96], sizes = [8, 32], strides = [1, 1]} : vector<8x384xf32> to vector<8x32xf32>
    %75 = arith.truncf %74 : vector<8x32xf32> to vector<8x32xbf16>
    %76 = vector.extract_strided_slice %7 {offsets = [0, 224], sizes = [8, 32], strides = [1, 1]} : vector<8x384xf32> to vector<8x32xf32>
    %77 = arith.truncf %76 : vector<8x32xf32> to vector<8x32xbf16>
    %78 = vector.extract_strided_slice %7 {offsets = [0, 352], sizes = [8, 32], strides = [1, 1]} : vector<8x384xf32> to vector<8x32xf32>
    %79 = arith.truncf %78 : vector<8x32xf32> to vector<8x32xbf16>
    %cst_28 = arith.constant dense<0.000000e+00> : vector<8x8xf32>
    %80 = tpu.matmul %75, %77, %cst_28 {dimension_numbers = #tpu.dot_dimension_numbers<[1], [1], [0], [0], [0, 0, 1, 0], [], []>} : vector<8x32xbf16>, vector<8x32xbf16>, vector<8x8xf32> -> vector<8x8xf32>
    %c0_29 = arith.constant 0 : index
    %c3 = arith.constant 3 : index
    %c0_30 = arith.constant 0 : index
    %c0_31 = arith.constant 0 : index
    %81 = vector.load %arg2[%c0_29, %c3, %c0_30, %c0_31] : memref<1x4x8x8xf32, #tpu.memory_space<vmem>>, vector<1x1x8x8xf32>
    %82 = vector.shape_cast %81 : vector<1x1x8x8xf32> to vector<8x8xf32>
    %83 = arith.addf %80, %82 : vector<8x8xf32>
    %cst_32 = arith.constant dense<0xFF800000> : vector<8xf32>
    %84 = vector.multi_reduction <maximumf>, %83, %cst_32 [1] : vector<8x8xf32> to vector<8xf32>
    %85 = vector.shape_cast %84 : vector<8xf32> to vector<8x1xf32>
    %86 = vector.broadcast %85 : vector<8x1xf32> to vector<8x8xf32>
    %87 = arith.subf %83, %86 : vector<8x8xf32>
    %88 = math.exp %87 : vector<8x8xf32>
    %cst_33 = arith.constant dense<0.000000e+00> : vector<8xf32>
    %89 = vector.multi_reduction <add>, %88, %cst_33 [1] : vector<8x8xf32> to vector<8xf32>
    %90 = vector.shape_cast %89 : vector<8xf32> to vector<8x1xf32>
    %91 = tpu.reciprocal %90 {approx = true} : vector<8x1xf32> -> vector<8x1xf32>
    %92 = vector.broadcast %91 : vector<8x1xf32> to vector<8x8xf32>
    %93 = arith.mulf %88, %92 : vector<8x8xf32>
    %94 = arith.truncf %93 : vector<8x8xf32> to vector<8x8xbf16>
    %cst_34 = arith.constant dense<0.000000e+00> : vector<8x32xf32>
    %95 = tpu.matmul %94, %79, %cst_34 {dimension_numbers = #tpu.dot_dimension_numbers<[1], [0], [0], [1], [0, 0, 1, 1], [], []>} : vector<8x8xbf16>, vector<8x32xbf16>, vector<8x32xf32> -> vector<8x32xf32>
    %96 = tpu.concatenate %29, %51, %73, %95 in 1 : vector<8x32xf32>, vector<8x32xf32>, vector<8x32xf32>, vector<8x32xf32> -> vector<8x128xf32>
    %97 = arith.truncf %96 : vector<8x128xf32> to vector<8x128xbf16>
    %c0_35 = arith.constant 0 : index
    %c0_36 = arith.constant 0 : index
    %98 = vector.load %arg5[%c0_35, %c0_36] : memref<128x128xbf16, #tpu.memory_space<vmem>>, vector<128x128xbf16>
    %cst_37 = arith.constant dense<0.000000e+00> : vector<8x128xf32>
    %99 = tpu.matmul %97, %98, %cst_37 {dimension_numbers = #tpu.dot_dimension_numbers<[1], [0], [0], [1], [0, 0, 1, 1], [], []>} : vector<8x128xbf16>, vector<128x128xbf16>, vector<8x128xf32> -> vector<8x128xf32>
    %c0_38 = arith.constant 0 : index
    %c0_39 = arith.constant 0 : index
    %100 = vector.load %arg6[%c0_38, %c0_39] : memref<1x128xf32, #tpu.memory_space<vmem>>, vector<1x128xf32>
    %101 = vector.broadcast %100 : vector<1x128xf32> to vector<8x128xf32>
    %102 = arith.addf %99, %101 : vector<8x128xf32>
    %103 = arith.addf %102, %1 : vector<8x128xf32>
    %cst_40 = arith.constant dense<0.000000e+00> : vector<8xf32>
    %104 = vector.multi_reduction <add>, %103, %cst_40 [1] : vector<8x128xf32> to vector<8xf32>
    %105 = vector.shape_cast %104 : vector<8xf32> to vector<8x1xf32>
    %cst_41 = arith.constant 1.280000e+02 : f32
    %106 = vector.broadcast %cst_41 : f32 to vector<8x1xf32>
    %107 = arith.divf %105, %106 : vector<8x1xf32>
    %108 = vector.broadcast %107 : vector<8x1xf32> to vector<8x128xf32>
    %109 = arith.subf %103, %108 : vector<8x128xf32>
    %110 = arith.mulf %109, %109 : vector<8x128xf32>
    %cst_42 = arith.constant dense<0.000000e+00> : vector<8xf32>
    %111 = vector.multi_reduction <add>, %110, %cst_42 [1] : vector<8x128xf32> to vector<8xf32>
    %112 = vector.shape_cast %111 : vector<8xf32> to vector<8x1xf32>
    %cst_43 = arith.constant 1.280000e+02 : f32
    %113 = vector.broadcast %cst_43 : f32 to vector<8x1xf32>
    %114 = arith.divf %112, %113 : vector<8x1xf32>
    %115 = vector.broadcast %107 : vector<8x1xf32> to vector<8x128xf32>
    %116 = arith.subf %103, %115 : vector<8x128xf32>
    %cst_44 = arith.constant 9.99999974E-6 : f32
    %117 = vector.broadcast %cst_44 : f32 to vector<8x1xf32>
    %118 = arith.addf %114, %117 : vector<8x1xf32>
    %119 = math.rsqrt %118 : vector<8x1xf32>
    %120 = vector.broadcast %119 : vector<8x1xf32> to vector<8x128xf32>
    %121 = arith.mulf %116, %120 : vector<8x128xf32>
    %c0_45 = arith.constant 0 : index
    %c0_46 = arith.constant 0 : index
    %122 = vector.load %arg7[%c0_45, %c0_46] : memref<1x128xf32, #tpu.memory_space<vmem>>, vector<1x128xf32>
    %123 = vector.broadcast %122 : vector<1x128xf32> to vector<8x128xf32>
    %124 = arith.mulf %121, %123 : vector<8x128xf32>
    %c0_47 = arith.constant 0 : index
    %c0_48 = arith.constant 0 : index
    %125 = vector.load %arg8[%c0_47, %c0_48] : memref<1x128xf32, #tpu.memory_space<vmem>>, vector<1x128xf32>
    %126 = vector.broadcast %125 : vector<1x128xf32> to vector<8x128xf32>
    %127 = arith.addf %124, %126 : vector<8x128xf32>
    %128 = arith.truncf %127 : vector<8x128xf32> to vector<8x128xbf16>
    %c0_49 = arith.constant 0 : index
    %c0_50 = arith.constant 0 : index
    %129 = vector.load %arg9[%c0_49, %c0_50] : memref<128x256xbf16, #tpu.memory_space<vmem>>, vector<128x256xbf16>
    %cst_51 = arith.constant dense<0.000000e+00> : vector<8x256xf32>
    %130 = tpu.matmul %128, %129, %cst_51 {dimension_numbers = #tpu.dot_dimension_numbers<[1], [0], [0], [1], [0, 0, 1, 1], [], []>} : vector<8x128xbf16>, vector<128x256xbf16>, vector<8x256xf32> -> vector<8x256xf32>
    %c0_52 = arith.constant 0 : index
    %c0_53 = arith.constant 0 : index
    %131 = vector.load %arg10[%c0_52, %c0_53] : memref<1x256xf32, #tpu.memory_space<vmem>>, vector<1x256xf32>
    %132 = vector.broadcast %131 : vector<1x256xf32> to vector<8x256xf32>
    %133 = arith.addf %130, %132 : vector<8x256xf32>
    %134 = arith.mulf %133, %133 : vector<8x256xf32>
    %135 = arith.mulf %133, %134 : vector<8x256xf32>
    %cst_54 = arith.constant 4.471500e-02 : f32
    %136 = vector.broadcast %cst_54 : f32 to vector<8x256xf32>
    %137 = arith.mulf %136, %135 : vector<8x256xf32>
    %138 = arith.addf %133, %137 : vector<8x256xf32>
    %cst_55 = arith.constant 0.797884583 : f32
    %139 = vector.broadcast %cst_55 : f32 to vector<8x256xf32>
    %140 = arith.mulf %139, %138 : vector<8x256xf32>
    %141 = math.tanh %140 : vector<8x256xf32>
    %cst_56 = arith.constant 1.000000e+00 : f32
    %142 = vector.broadcast %cst_56 : f32 to vector<8x256xf32>
    %143 = arith.addf %142, %141 : vector<8x256xf32>
    %cst_57 = arith.constant 5.000000e-01 : f32
    %144 = vector.broadcast %cst_57 : f32 to vector<8x256xf32>
    %145 = arith.mulf %144, %143 : vector<8x256xf32>
    %146 = arith.mulf %133, %145 : vector<8x256xf32>
    %147 = arith.truncf %146 : vector<8x256xf32> to vector<8x256xbf16>
    %c0_58 = arith.constant 0 : index
    %c0_59 = arith.constant 0 : index
    %148 = vector.load %arg11[%c0_58, %c0_59] : memref<256x128xbf16, #tpu.memory_space<vmem>>, vector<256x128xbf16>
    %cst_60 = arith.constant dense<0.000000e+00> : vector<8x128xf32>
    %149 = tpu.matmul %147, %148, %cst_60 {dimension_numbers = #tpu.dot_dimension_numbers<[1], [0], [0], [1], [0, 0, 1, 1], [], []>} : vector<8x256xbf16>, vector<256x128xbf16>, vector<8x128xf32> -> vector<8x128xf32>
    %c0_61 = arith.constant 0 : index
    %c0_62 = arith.constant 0 : index
    %150 = vector.load %arg12[%c0_61, %c0_62] : memref<1x128xf32, #tpu.memory_space<vmem>>, vector<1x128xf32>
    %151 = vector.broadcast %150 : vector<1x128xf32> to vector<8x128xf32>
    %152 = arith.addf %149, %151 : vector<8x128xf32>
    %153 = arith.addf %152, %127 : vector<8x128xf32>
    %cst_63 = arith.constant dense<0.000000e+00> : vector<8xf32>
    %154 = vector.multi_reduction <add>, %153, %cst_63 [1] : vector<8x128xf32> to vector<8xf32>
    %155 = vector.shape_cast %154 : vector<8xf32> to vector<8x1xf32>
    %cst_64 = arith.constant 1.280000e+02 : f32
    %156 = vector.broadcast %cst_64 : f32 to vector<8x1xf32>
    %157 = arith.divf %155, %156 : vector<8x1xf32>
    %158 = vector.broadcast %157 : vector<8x1xf32> to vector<8x128xf32>
    %159 = arith.subf %153, %158 : vector<8x128xf32>
    %160 = arith.mulf %159, %159 : vector<8x128xf32>
    %cst_65 = arith.constant dense<0.000000e+00> : vector<8xf32>
    %161 = vector.multi_reduction <add>, %160, %cst_65 [1] : vector<8x128xf32> to vector<8xf32>
    %162 = vector.shape_cast %161 : vector<8xf32> to vector<8x1xf32>
    %cst_66 = arith.constant 1.280000e+02 : f32
    %163 = vector.broadcast %cst_66 : f32 to vector<8x1xf32>
    %164 = arith.divf %162, %163 : vector<8x1xf32>
    %165 = vector.broadcast %157 : vector<8x1xf32> to vector<8x128xf32>
    %166 = arith.subf %153, %165 : vector<8x128xf32>
    %cst_67 = arith.constant 9.99999974E-6 : f32
    %167 = vector.broadcast %cst_67 : f32 to vector<8x1xf32>
    %168 = arith.addf %164, %167 : vector<8x1xf32>
    %169 = math.rsqrt %168 : vector<8x1xf32>
    %170 = vector.broadcast %169 : vector<8x1xf32> to vector<8x128xf32>
    %171 = arith.mulf %166, %170 : vector<8x128xf32>
    %c0_68 = arith.constant 0 : index
    %c0_69 = arith.constant 0 : index
    %172 = vector.load %arg13[%c0_68, %c0_69] : memref<1x128xf32, #tpu.memory_space<vmem>>, vector<1x128xf32>
    %173 = vector.broadcast %172 : vector<1x128xf32> to vector<8x128xf32>
    %174 = arith.mulf %171, %173 : vector<8x128xf32>
    %c0_70 = arith.constant 0 : index
    %c0_71 = arith.constant 0 : index
    %175 = vector.load %arg14[%c0_70, %c0_71] : memref<1x128xf32, #tpu.memory_space<vmem>>, vector<1x128xf32>
    %176 = vector.broadcast %175 : vector<1x128xf32> to vector<8x128xf32>
    %177 = arith.addf %174, %176 : vector<8x128xf32>
    %c0_72 = arith.constant 0 : index
    %c0_73 = arith.constant 0 : index
    %c0_74 = arith.constant 0 : index
    %178 = vector.load %arg15[%c0_72, %c0_73, %c0_74] : memref<1x8x128xf32, #tpu.memory_space<vmem>>, vector<1x8x128xf32>
    %179 = vector.shape_cast %178 : vector<1x8x128xf32> to vector<8x128xf32>
    %180 = vector.shape_cast %177 : vector<8x128xf32> to vector<1x8x128xf32>
    tpu.vector_store %arg15[%c0_72, %c0_73, %c0_74], %180 {strides = array<i32>} : memref<1x8x128xf32, #tpu.memory_space<vmem>>, vector<1x8x128xf32>,
    return
  }
  func.func @transform_0(%arg0: i32) -> (i32, i32, i32) {
    %c0_i32 = arith.constant 0 : i32
    %c0_i32_0 = arith.constant 0 : i32
    %c0_i32_1 = arith.constant 0 : i32
    return %arg0, %c0_i32, %c0_i32_0 : i32, i32, i32
  }
  func.func @transform_1(%arg0: i32) -> (i32, i32, i32, i32) {
    %c0_i32 = arith.constant 0 : i32
    %c0_i32_0 = arith.constant 0 : i32
    %c0_i32_1 = arith.constant 0 : i32
    %c0_i32_2 = arith.constant 0 : i32
    return %arg0, %c0_i32, %c0_i32_0, %c0_i32_1 : i32, i32, i32, i32
  }
  func.func @transform_2(%arg0: i32) -> (i32, i32) {
    %c0_i32 = arith.constant 0 : i32
    %c0_i32_0 = arith.constant 0 : i32
    %c0_i32_1 = arith.constant 0 : i32
    return %c0_i32, %c0_i32_0 : i32, i32
  }
  func.func @transform_3(%arg0: i32) -> (i32, i32) {
    %c0_i32 = arith.constant 0 : i32
    %c0_i32_0 = arith.constant 0 : i32
    %c0_i32_1 = arith.constant 0 : i32
    return %c0_i32, %c0_i32_0 : i32, i32
  }
  func.func @transform_4(%arg0: i32) -> (i32, i32) {
    %c0_i32 = arith.constant 0 : i32
    %c0_i32_0 = arith.constant 0 : i32
    %c0_i32_1 = arith.constant 0 : i32
    return %c0_i32, %c0_i32_0 : i32, i32
  }
  func.func @transform_5(%arg0: i32) -> (i32, i32) {
    %c0_i32 = arith.constant 0 : i32
    %c0_i32_0 = arith.constant 0 : i32
    %c0_i32_1 = arith.constant 0 : i32
    return %c0_i32, %c0_i32_0 : i32, i32
  }
  func.func @transform_6(%arg0: i32) -> (i32, i32) {
    %c0_i32 = arith.constant 0 : i32
    %c0_i32_0 = arith.constant 0 : i32
    %c0_i32_1 = arith.constant 0 : i32
    return %c0_i32, %c0_i32_0 : i32, i32
  }
  func.func @transform_7(%arg0: i32) -> (i32, i32) {
    %c0_i32 = arith.constant 0 : i32
    %c0_i32_0 = arith.constant 0 : i32
    %c0_i32_1 = arith.constant 0 : i32
    return %c0_i32, %c0_i32_0 : i32, i32
  }
  func.func @transform_8(%arg0: i32) -> (i32, i32) {
    %c0_i32 = arith.constant 0 : i32
    %c0_i32_0 = arith.constant 0 : i32
    %c0_i32_1 = arith.constant 0 : i32
    return %c0_i32, %c0_i32_0 : i32, i32
  }
  func.func @transform_9(%arg0: i32) -> (i32, i32) {
    %c0_i32 = arith.constant 0 : i32
    %c0_i32_0 = arith.constant 0 : i32
    %c0_i32_1 = arith.constant 0 : i32
    return %c0_i32, %c0_i32_0 : i32, i32
  }
  func.func @transform_10(%arg0: i32) -> (i32, i32) {
    %c0_i32 = arith.constant 0 : i32
    %c0_i32_0 = arith.constant 0 : i32
    %c0_i32_1 = arith.constant 0 : i32
    return %c0_i32, %c0_i32_0 : i32, i32
  }
  func.func @transform_11(%arg0: i32) -> (i32, i32) {
    %c0_i32 = arith.constant 0 : i32
    %c0_i32_0 = arith.constant 0 : i32
    %c0_i32_1 = arith.constant 0 : i32
    return %c0_i32, %c0_i32_0 : i32, i32
  }
  func.func @transform_12(%arg0: i32) -> (i32, i32) {
    %c0_i32 = arith.constant 0 : i32
    %c0_i32_0 = arith.constant 0 : i32
    %c0_i32_1 = arith.constant 0 : i32
    return %c0_i32, %c0_i32_0 : i32, i32
  }
  func.func @transform_13(%arg0: i32) -> (i32, i32) {
    %c0_i32 = arith.constant 0 : i32
    %c0_i32_0 = arith.constant 0 : i32
    %c0_i32_1 = arith.constant 0 : i32
    return %c0_i32, %c0_i32_0 : i32, i32
  }
  func.func @transform_14(%arg0: i32) -> (i32, i32, i32) {
    %c0_i32 = arith.constant 0 : i32
    %c0_i32_0 = arith.constant 0 : i32
    %c0_i32_1 = arith.constant 0 : i32
    return %arg0, %c0_i32, %c0_i32_0 : i32, i32, i32
  }
}

</mosaic_0001>

<bundles_post_ra>
// kernel: tpu_custom_call.1
= control target key start
LH: loop header
LB: loop body
LE: loop exit
PB: predicated region body
PF: predicated region fallthrough
CT: control target
= control target key end

     0   :  { %s3271_s0 = inlined_call_operand.hbm [shape: f32[2,8,128], index: 0, kind: input, shape index: {}]   ;;  %s3272_s1 = inlined_call_operand.hbm [shape: f32[2,4,8,8], index: 1, kind: input, shape index: {}]   ;;  %s3273_s2 = inlined_call_operand.hbm [shape: bf16[128,384], index: 2, kind: input, shape index: {}]   ;;  %s3274_s3 = inlined_call_operand.vmem [shape: f32[1,384], index: 3, kind: input, shape index: {}]   ;;  %s3275_s4 = inlined_call_operand.hbm [shape: bf16[128,128], index: 4, kind: input, shape index: {}]   ;;  %s3276_s5 = inlined_call_operand.vmem [shape: f32[1,128], index: 5, kind: input, shape index: {}]   ;;  %s3277_s6 = inlined_call_operand.vmem [shape: f32[1,128], index: 6, kind: input, shape index: {}]   ;;  %s3278_s7 = inlined_call_operand.vmem [shape: f32[1,128], index: 7, kind: input, shape index: {}]   ;;  %s3279_s8 = inlined_call_operand.hbm [shape: bf16[128,256], index: 8, kind: input, shape index: {}]   ;;  %s3280_s9 = inlined_call_operand.vmem [shape: f32[1,256], index: 9, kind: input, shape index: {}]   ;;  %s3281_s10 = inlined_call_operand.hbm [shape: bf16[256,128], index: 10, kind: input, shape index: {}]   ;;  %s3282_s11 = inlined_call_operand.vmem [shape: f32[1,128], index: 11, kind: input, shape index: {}]   ;;  %s3283_s12 = inlined_call_operand.vmem [shape: f32[1,128], index: 12, kind: input, shape index: {}]   ;;  %s3284_s13 = inlined_call_operand.vmem [shape: f32[1,128], index: 13, kind: input, shape index: {}]   ;;  %s3285_s14 = inlined_call_operand.hbm [shape: f32[2,8,128], index: 14, kind: output, shape index: {}]  }
   0x1   :  { %3294 = sst [smem:[#allocation20_spill]] %s3271_s0 }
   0x2   :  { %3295 = sst [smem:[#allocation21_spill]] %s3273_s2 }
   0x3   :  { %3296 = sst [smem:[#allocation22_spill]] %s3275_s4 }
   0x4   :  { %3297 = sst [smem:[#allocation23_spill]] %s3278_s7 }
   0x5   :  { %3298 = sst [smem:[#allocation24_spill]] %s3279_s8 }
   0x6   :  { %3299 = sst [smem:[#allocation25_spill]] %s3280_s9 }
   0x7   :  { %3300 = sst [smem:[#allocation26_spill]] %s3282_s11 }
   0x8   :  { %3301 = sst [smem:[#allocation27_spill]] %s3283_s12 }
   0x9   :  { %3302 = sst [smem:[#allocation28_spill]] %s3284_s13 }
   0xa   :  { %3303 = sst [smem:[#allocation29_spill]] %s3285_s14 }
   0xb   :  { %19 = vsyncpa [#allocation3], 0 }
   0xc   :  { %21 = vsyncpa [#allocation3 + $0x1], 0 }
   0xd   :  { %22 = vsyncpa [#allocation6], 0 }
   0xe   :  { %24 = vsyncpa [#allocation6 + $0x1], 0 }
   0xf   :  { %25 = vsyncpa [#allocation9], 0 }
  0x10   :  { %26 = vsyncpa [#allocation12], 0 }
  0x11   :  { %27 = vsyncpa [#allocation4], 0 }
  0x12   :  { %29 = vsyncpa [#allocation4 + $0x1], 0  ;;  %s2777_s29 = smov 0   ;;  %s2779_s30 = smov 0  }
  0x13   :  { %s2781_s15 = smov 0   ;;  %s2783_s16 = smov 0  }
  0x14 LB: > { %s2683_s17 = smov [#allocation7]   ;;  %s2798_s19 = sadd.s32 4294967295, %s2681_s16   ;;  %s2681_s16 = sphi %s2783_s16, %s3341_s16   ;;  %s2677_s15 = sphi %s2781_s15, %s3340_s15   ;;  %s2673_s30 = sphi %s2779_s30, %s3339_s30   ;;  %s2669_s29 = sphi %s2777_s29, %s3338_s29  }
  0x15   : > { %s382_s18 = sshll.u32 %s2683_s17, 4  ;;  %p1970_p0 = scmp.ge.s32.totalorder %s2681_s16, 1  ;;  %s2803_s18 = int_to_ptr.vmem [resolvable:$true] %s382_s18 }
  0x16   : > { %p3287_p1 = scmp.eq.s32.totalorder %s2798_s19, 0  ;;  %p370_p2 = scmp.lt.s32.totalorder %s2681_s16, 3 }
  0x17   : > { %s2684_s21 = smov [#allocation8]   ;;  %s2685_s24 = smov [#allocation10]  }
  0x18   : > { %p2805_p3 = pnand %p1970_p0, %p370_p2  ;;  %s398_s22 = sshll.u32 %s2684_s21, 4  ;;  %s2818_s22 = int_to_ptr.vmem [resolvable:$true] %s398_s22 }
  0x19   : > { %s2820_s25 = sshll.u32 %s2685_s24, 4  ;;  %s3306_s2 = sld [smem:[#allocation21_spill]]  ;;  %s421_s25 = int_to_ptr.vmem [resolvable:$true] %s2820_s25 }
  0x1a   : > { %s3304_s20 = scalar_select %p2805_p3, 1, 0 }
  0x1b   : > { %p2241_p5 = pneg %p2805_p3 }
  0x1d   : > { %p2814_p6 = pnand %p2241_p5, %p3287_p1 }
  0x1f   : > { %s2427_s28 = scalar_lea.hbm %s3306_s2, 3072  ;;  %p2830_p8 = pneg %p2814_p6 }
  0x20   : > { %p2428_p7 = scmp.ne.s32.totalorder %s3306_s2, %s2427_s28  ;;  %p2434_p11 = scmp.lt.u32.totalorder %s2427_s28, %s3306_s2 }
  0x22   : > { %p2430_p9 = pnand %p2830_p8, %p2428_p7 }
  0x24   : > { %p2431_p10 = pneg %p2430_p9 }
  0x26   : > { %p2436_p12 = pnand %p2434_p11, %p2431_p10 }
  0x28   : > { %2439 = shalt.err (!%p2436_p12)
}
  0x29   : > { %s2440_s14 = scalar_lea.vmem %s2803_s18, 3072  ;;  %p2448_p5 = scmp.lt.s32.totalorder %s2803_s18, %s2803_s18 }
  0x2a   : > { %p2441_p13 = scmp.ne.s32.totalorder %s2803_s18, %s2440_s14  ;;  %p2449_p4 = scmp.lt.s32.totalorder %s2440_s14, %s2440_s14 }
  0x2c   : > { %p2443_p0 = pnand %p2441_p13, %p2830_p8  ;;  %p2450_p7 = por %p2449_p4, %p2448_p5 }
  0x2e   : > { %p2444_p2 = pneg %p2443_p0 }
  0x30   : > { %p2451_p9 = pnand %p2450_p7, %p2444_p2 }
  0x32   : > { %2454 = shalt.err (!%p2451_p9)
}
  0x33   : > { %s2686_s26 = smov 192   ;;  %s2687_s13 = smov 12  }
  0x34   : > { %2244 = dma.hbm_to_vmem [thread:$0]  (!%p2814_p6), %s3306_s2, 3072, %s2803_s18, [#allocation6], %s2686_s26, %s2686_s26, %s2687_s13  }
  0x35   : > { %s3308_s4 = sld [smem:[#allocation22_spill]] }
  0x3b   : > { %s2455_s12 = scalar_lea.hbm %s3308_s4, 1024 }
  0x3c   : > { %p2456_p4 = scmp.ne.s32.totalorder %s3308_s4, %s2455_s12  ;;  %p2462_p12 = scmp.lt.u32.totalorder %s2455_s12, %s3308_s4 }
  0x3e   : > { %p2458_p10 = pnand %p2456_p4, %p2830_p8 }
  0x40   : > { %p2459_p11 = pneg %p2458_p10 }
  0x42   : > { %p2464_p13 = pnand %p2462_p12, %p2459_p11 }
  0x44   : > { %2467 = shalt.err (!%p2464_p13)
}
  0x45   : > { %s2468_s18 = scalar_lea.vmem %s2818_s22, 1024  ;;  %p2476_p7 = scmp.lt.s32.totalorder %s2818_s22, %s2818_s22 }
  0x46   : > { %p2469_p0 = scmp.ne.s32.totalorder %s2818_s22, %s2468_s18  ;;  %p2477_p9 = scmp.lt.s32.totalorder %s2468_s18, %s2468_s18 }
  0x48   : > { %p2471_p2 = pnand %p2469_p0, %p2830_p8  ;;  %p2478_p4 = por %p2477_p9, %p2476_p7 }
  0x4a   : > { %p2472_p5 = pneg %p2471_p2 }
  0x4c   : > { %p2479_p10 = pnand %p2478_p4, %p2472_p5 }
  0x4e   : > { %2482 = shalt.err (!%p2479_p10)
}
  0x4f   : > { %s3289_s9 = smov 64   ;;  %s3290_s7 = smov 4  }
  0x50   : > { %2247 = dma.hbm_to_vmem [thread:$0]  (!%p2814_p6), %s3308_s4, 1024, %s2818_s22, [#allocation9], %s3289_s9, %s3289_s9, %s3290_s7  }
  0x51   : > { %s3309_s8 = sld [smem:[#allocation24_spill]] }
  0x57   : > { %s2483_s27 = scalar_lea.hbm %s3309_s8, 2048 }
  0x58   : > { %p2484_p11 = scmp.ne.s32.totalorder %s3309_s8, %s2483_s27  ;;  %p2490_p0 = scmp.lt.u32.totalorder %s2483_s27, %s3309_s8 }
  0x5a   : > { %p2486_p12 = pnand %p2484_p11, %p2830_p8 }
  0x5c   : > { %p2487_p13 = pneg %p2486_p12 }
  0x5e   : > { %p2492_p2 = pnand %p2490_p0, %p2487_p13 }
  0x60   : > { %2495 = shalt.err (!%p2492_p2)
}
  0x61   : > { %s2496_s18 = scalar_lea.vmem %s421_s25, 2048  ;;  %p2504_p4 = scmp.lt.s32.totalorder %s421_s25, %s421_s25 }
  0x62   : > { %p2497_p5 = scmp.ne.s32.totalorder %s421_s25, %s2496_s18  ;;  %p2505_p10 = scmp.lt.s32.totalorder %s2496_s18, %s2496_s18 }
  0x64   : > { %p2499_p7 = pnand %p2497_p5, %p2830_p8  ;;  %p2506_p1 = por %p2505_p10, %p2504_p4 }
  0x66   : > { %p2500_p9 = pneg %p2499_p7 }
  0x68   : > { %p2507_p3 = pnand %p2506_p1, %p2500_p9 }
  0x6a   : > { %2510 = shalt.err (!%p2507_p3)
}
  0x6b   : > { %s3291_s22 = smov 128   ;;  %s3292_s11 = smov 8  }
  0x6c   : > { %2250 = dma.hbm_to_vmem [thread:$0]  (!%p2814_p6), %s3309_s8, 2048, %s421_s25, [#allocation9], %s3291_s22, %s3291_s22, %s3292_s11  }
  0x6d   : > { %s2692_s13 = smov [#allocation11]   ;;  %s2511_s24 = scalar_lea.hbm %s3281_s10, 2048 }
  0x6e   : > { %s436_s27 = sshll.u32 %s2692_s13, 4  ;;  %p2512_p1 = scmp.ne.s32.totalorder %s3281_s10, %s2511_s24  ;;  %s437_s27 = int_to_ptr.vmem [resolvable:$true] %s436_s27 }
  0x6f   : > { %p2518_p12 = scmp.lt.u32.totalorder %s2511_s24, %s3281_s10 }
  0x70   : > { %p2514_p3 = pnand %p2512_p1, %p2830_p8 }
  0x72   : > { %p2515_p11 = pneg %p2514_p3 }
  0x74   : > { %p2520_p13 = pnand %p2518_p12, %p2515_p11 }
  0x76   : > { %2523 = shalt.err (!%p2520_p13)
}
  0x77   : > { %s2524_s25 = scalar_lea.vmem %s437_s27, 2048  ;;  %p2532_p7 = scmp.lt.s32.totalorder %s437_s27, %s437_s27 }
  0x78   : > { %p2525_p0 = scmp.ne.s32.totalorder %s437_s27, %s2524_s25  ;;  %p2533_p9 = scmp.lt.s32.totalorder %s2524_s25, %s2524_s25 }
  0x7a   : > { %p2527_p2 = pnand %p2525_p0, %p2830_p8  ;;  %p2534_p4 = por %p2533_p9, %p2532_p7 }
  0x7c   : > { %p2528_p5 = pneg %p2527_p2 }
  0x7e   : > { %p2535_p10 = pnand %p2534_p4, %p2528_p5 }
  0x80   : > { %2538 = shalt.err (!%p2535_p10)
}
  0x81   : > { %s3310_s12 = smov 4   ;;  %s3311_s26 = smov 64  }
  0x82   : > { %2253 = dma.hbm_to_vmem [thread:$0]  (!%p2814_p6), %s3281_s10, 2048, %s437_s27, [#allocation12], %s3311_s26, %s3311_s26, %s3310_s12  }
  0x83   : > { %s1969_s23 = sadd.s32 4294967294, %s2681_s16   ;;  %s2922_s21 = sadd.s32 1, %s2681_s16  }
  0x84   : > { %s39_s13 = ssub.s32 %s2681_s16, %s2922_s21  ;;  %s42_s28 = sadd.s32 1, %s2677_s15 }
  0x85   : > { %p40_p8 = scmp.eq.s32.totalorder %s39_s13, 0  ;;  %p49_p1 = scmp.ne.s32.totalorder %s2677_s15, %s2673_s30 }
  0x86   : > { %p50_p3 = scmp.eq.s32.totalorder %s2681_s16, 0  ;;  %p55_p11 = scmp.ne.s32.totalorder %s2673_s30, %s2669_s29 }
  0x87   : > { %s2933_s17 = scalar_select %p40_p8, %s2677_s15, %s42_s28  }
  0x88   : > { %p2935_p12 = por %p50_p3, %p49_p1  ;;  %p3313_p13 = scmp.eq.s32.totalorder %s2798_s19, 0 }
  0x89   : > { %p357_p0 = scmp.eq.s32.totalorder %s2798_s19, 1  ;;  %p363_p2 = scmp.eq.s32.totalorder %s1969_s23, 1 }
  0x8a   : > { %p2941_p6 = por %p3313_p13, %p55_p11  ;;  %p2269_p5 = scmp.lt.s32.totalorder %s2681_s16, 2 }
  0x8b   : > { %s2948_s14 = sand.u32 1, %s2677_s15   ;;  %p2950_p7 = por %p357_p0, %p49_p1 }
  0x8c   : > { %p2954_p9 = por %p363_p2, %p55_p11  ;;  %s1976_s12 = sshll.u32 %s2948_s14, 3 }
  0x8d   : > { %s3315_s18 = scalar_select %p2950_p7, 1, 0 }
  0x8e   : > { %s3316_s25 = scalar_select %p2954_p9, 1, 0 }
  0x8f   : > { %s1977_s26 = sshll.u32 %s2681_s16, 7  ;;  %s3317_s0 = sld [smem:[#allocation20_spill]] }
  0x90   : > { %s463_s13 = scalar_lea.vmem [#allocation2], %s1976_s12  ;;  %p2969_p4 = pnand %p2269_p5, %p2935_p12 }
  0x91   : > { %s470_s28 = sshll.u32 %s463_s13, 4  ;;  %s1978_s11 = sshll.u32 %s2948_s14, 5  ;;  %s2965_s28 = int_to_ptr.vmem [resolvable:$true] %s470_s28 }
  0x92   : > { %s460_s9 = scalar_lea.sflag [#allocation3], %s2948_s14  ;;  %p2541_p8 = pneg %p2969_p4 }
  0x95   : > { %s2963_s23 = scalar_lea.hbm %s3317_s0, %s1977_s26  ;;  %s2544_s24 = scalar_lea.hbm %s3317_s0, 256 }
  0x96   : > { %s2539_s26 = scalar_lea.hbm %s2963_s23, 128  ;;  %p2545_p11 = scmp.lt.u32.totalorder %s2963_s23, %s3317_s0 }
  0x97   : > { %p2540_p10 = scmp.ne.s32.totalorder %s2963_s23, %s2539_s26  ;;  %p2546_p12 = scmp.lt.u32.totalorder %s2544_s24, %s2539_s26 }
  0x98   : > { %p2548_p0 = scmp.lt.u32.totalorder %s2539_s26, %s2963_s23 }
  0x99   : > { %p2542_p1 = pnand %p2541_p8, %p2540_p10  ;;  %p2547_p13 = por %p2546_p12, %p2545_p11 }
  0x9b   : > { %p2543_p3 = pneg %p2542_p1  ;;  %p2549_p2 = por %p2548_p0, %p2547_p13 }
  0x9d   : > { %p2550_p5 = pnand %p2549_p2, %p2543_p3 }
  0x9f   : > { %2553 = shalt.err (!%p2550_p5)
}
  0xa0   : > { %s2554_s2 = scalar_lea.vmem %s2965_s28, 128  ;;  %s2693_s12 = smov [#allocation2]  }
  0xa1   : > { %p2555_p10 = scmp.ne.s32.totalorder %s2965_s28, %s2554_s2  ;;  %s2559_s7 = sshll.u32 %s2693_s12, 4  ;;  %s2560_s7 = int_to_ptr.vmem [resolvable:$false] %s2559_s7 }
  0xa2   : > { %s2561_s4 = scalar_lea.vmem %s2560_s7, 256  ;;  %p2562_p7 = scmp.lt.s32.totalorder %s2965_s28, %s2560_s7 }
  0xa3   : > { %p2557_p1 = pnand %p2555_p10, %p2541_p8  ;;  %p2563_p11 = scmp.lt.s32.totalorder %s2561_s4, %s2554_s2 }
  0xa5   : > { %p2558_p9 = pneg %p2557_p1  ;;  %p2564_p12 = por %p2563_p11, %p2562_p7 }
  0xa7   : > { %p2565_p13 = pnand %p2564_p12, %p2558_p9 }
  0xa9   : > { %2568 = shalt.err (!%p2565_p13)
}
  0xaa   : > { %2257 = dma.hbm_to_vmem [thread:$0]  (!%p2969_p4), %s2963_s23, 128, %s2965_s28, %s460_s9  }
  0xab   : > { %s481_s26 = scalar_lea.vmem [#allocation5], %s1978_s11  ;;  %s2074_s13 = sshll.u32 %s2681_s16, 9 }
  0xac   : > { %s488_s24 = sshll.u32 %s481_s26, 4  ;;  %s3009_s7 = scalar_lea.hbm %s3272_s1, %s2074_s13  ;;  %s3003_s24 = int_to_ptr.vmem [resolvable:$true] %s488_s24 }
  0xad   : > { %s3319_s4 = sand.u32 1, %s2681_s16   ;;  %s2569_s8 = scalar_lea.hbm %s3009_s7, 512 }
  0xae   : > { %s3013_s0 = scalar_lea.sflag [#allocation6], %s3319_s4  ;;  %p2570_p7 = scmp.ne.s32.totalorder %s3009_s7, %s2569_s8 }
  0xaf   : > { %s2574_s23 = scalar_lea.hbm %s3272_s1, 1024  ;;  %p2575_p0 = scmp.lt.u32.totalorder %s3009_s7, %s3272_s1 }
  0xb0   : > { %p2572_p9 = pnand %p2570_p7, %p2541_p8  ;;  %p2576_p2 = scmp.lt.u32.totalorder %s2574_s23, %s2569_s8 }
  0xb1   : > { %p2578_p10 = scmp.lt.u32.totalorder %s2569_s8, %s3009_s7 }
  0xb2   : > { %p2573_p3 = pneg %p2572_p9  ;;  %p2577_p5 = por %p2576_p2, %p2575_p0 }
  0xb4   : > { %p2579_p1 = por %p2578_p10, %p2577_p5 }
  0xb6   : > { %p2580_p11 = pnand %p2579_p1, %p2573_p3 }
  0xb8   : > { %2583 = shalt.err (!%p2580_p11)
}
  0xb9   : > { %s2584_s26 = scalar_lea.vmem %s3003_s24, 512  ;;  %s2694_s13 = smov [#allocation5]  }
  0xba   : > { %p2585_p12 = scmp.ne.s32.totalorder %s3003_s24, %s2584_s26  ;;  %s2589_s12 = sshll.u32 %s2694_s13, 4  ;;  %s2590_s12 = int_to_ptr.vmem [resolvable:$false] %s2589_s12 }
  0xbb   : > { %s2591_s2 = scalar_lea.vmem %s2590_s12, 1024  ;;  %p2592_p9 = scmp.lt.s32.totalorder %s3003_s24, %s2590_s12 }
  0xbc   : > { %p2587_p13 = pnand %p2585_p12, %p2541_p8  ;;  %p2593_p0 = scmp.lt.s32.totalorder %s2591_s2, %s2584_s26 }
  0xbe   : > { %p2588_p7 = pneg %p2587_p13  ;;  %p2594_p2 = por %p2593_p0, %p2592_p9 }
  0xc0   : > { %p2595_p5 = pnand %p2594_p2, %p2588_p7 }
  0xc2   : > { %2598 = shalt.err (!%p2595_p5)
}
  0xc3   : > { %s3320_s8 = smov 8   ;;  %s3321_s4 = smov 128  }
  0xc4   : > { %2260 = dma.hbm_to_vmem [thread:$0]  (!%p2969_p4), %s3009_s7, 512, %s3003_s24, %s3013_s0, %s3321_s4, %s3321_s4, %s3320_s8  }
  0xc5   : > { %p3322_p8 = scmp.ne.s32.totalorder %s3304_s20, 0 }
  0xc6   : > { %s3045_s11 = sand.u32 (!%p3322_p8), 1, %s2673_s30  }
  0xc7   : > { %500 = sbr.rel (%p3322_p8) target bundleno = 3219 (0xc93), region = 76  ;;  %s1982_s14 = sshll.u32 (!%p3322_p8), %s3045_s11, 3 }
  0xc8   : > { %s503_s23 = scalar_lea.sflag (!%p3322_p8), [#allocation3], %s3045_s11  ;;  %s3051_s22 = scalar_lea.vmem (!%p3322_p8), [#allocation2], %s1982_s14 }
  0xce   : > { %2644 = dma.done.wait (%p2941_p6), %s503_s23, 128  }
  0xcf   : > { %2646 = vsyncadd (%p2941_p6), %s503_s23, 4294967168  ;;  %s511_s0 = sand.u32 1, %s2798_s19   ;;  %s1983_s20 = sshll.u32 %s3045_s11, 5 }
  0xd0   : > { %s512_s24 = scalar_lea.sflag [#allocation6], %s511_s0  ;;  %s3059_s7 = scalar_lea.vmem [#allocation5], %s1983_s20 }
  0xd1   : > { %2648 = dma.done.wait (%p2941_p6), %s512_s24, 512  }
  0xd2   : > { %2650 = vsyncadd (%p2941_p6), %s512_s24, 4294966784  ;;  %p3323_p4 = scmp.eq.s32.totalorder %s2798_s19, 0 }
  0xd4   : > { %2652 = dma.done.wait (%p3323_p4), [#allocation6], 3072   ;;  %p3324_p3 = pmov %p3323_p4 }
  0xd6   : > { %2654 = vsyncadd (%p3324_p3), [#allocation6], 4294964224  ;;  %p3325_p10 = pmov %p3324_p3 }
  0xd7   : > { %p3326_p1 = pmov %p3324_p3 }
  0xd8   : > { %2656 = dma.done.wait (%p3325_p10), [#allocation9], 3072  }
  0xd9   : > { %2658 = vsyncadd (%p3326_p1), [#allocation9], 4294964224  ;;  %p3327_p11 = pmov %p3326_p1 }
  0xda   : > { %p3328_p12 = pmov %p3326_p1 }
  0xdb   : > { %2660 = dma.done.wait (%p3327_p11), [#allocation12], 2048  }
  0xdc   : > { %2662 = vsyncadd (%p3328_p12), [#allocation12], 4294965248  ;;  %v2695_v0 = vmov 0   ;;  %v2696_v1 = vmov 0.0   ;;  %v2323_v2 = vld [vmem:[#allocation7 + $0x4] ss:$12 sps:$4 sm:$0xff]   ;;  %v618_v28 = vlaneseq }
  0xdd   : > { %793 = vmatprep.mubr.bf16.mxu0 %v2695_v0  ;;  %2131 = vmatprep.subr.bf16.mxu1 %v2696_v1  ;;  %v2325_v3 = vld [vmem:[#allocation7] ss:$12 sps:$4 sm:$0xff]   ;;  %v2326_v4 = vld [vmem:[#allocation7 + $0x1c] ss:$12 sps:$4 sm:$0xff]   ;;  %v2328_v5 = vld [vmem:[#allocation7 + $0x18] ss:$12 sps:$4 sm:$0xff]  }
  0xde   : > { %761 = vmatprep.subr.bf16.mxu0 %v2323_v2  ;;  %v2329_v6 = vld [vmem:[#allocation7 + $0x34] ss:$12 sps:$4 sm:$0xff]   ;;  %v2331_v7 = vld [vmem:[#allocation7 + $0x30] ss:$12 sps:$4 sm:$0xff]   ;;  %v2332_v8 = vld [vmem:[#allocation7 + $0x4c] ss:$12 sps:$4 sm:$0xff]  }
  0xdf   : > { %762 = vmatpush1.bf16.msra.mxu0 %v2325_v3  ;;  %v2334_v9 = vld [vmem:[#allocation7 + $0x48] ss:$12 sps:$4 sm:$0xff]   ;;  %v2335_v11 = vld [vmem:[#allocation7 + $0x64] ss:$12 sps:$4 sm:$0xff]   ;;  %v2348_v12 = vld [vmem:[#allocation7 + $0x20] ss:$12 sps:$4 sm:$0xff]  }
  0xe0   : > { %763 = vmatprep.subr.bf16.mxu0 %v2326_v4  ;;  %v2347_v10 = vld [vmem:[#allocation7 + $0x8] ss:$12 sps:$4 sm:$0xff]   ;;  %v2337_v13 = vld [vmem:[#allocation7 + $0x60] ss:$12 sps:$4 sm:$0xff]   ;;  %v2340_v15 = vld [vmem:[#allocation7 + $0x78] ss:$12 sps:$4 sm:$0xff]  }
  0xe1   : > { %2132 = vmatpush3.bf16.msra.mxu1 %v2347_v10  ;;  %v2338_v14 = vld [vmem:[#allocation7 + $0x7c] ss:$12 sps:$4 sm:$0xff]   ;;  %v2349_v16 = vld [vmem:[#allocation7 + $0x38] ss:$12 sps:$4 sm:$0xff]   ;;  %v2341_v17 = vld [vmem:[#allocation7 + $0x94] ss:$12 sps:$4 sm:$0xff]  }
  0xe2   : > { %2133 = vmatprep.subr.bf16.mxu1 %v2696_v1  ;;  %v2350_v18 = vld [vmem:[#allocation7 + $0x50] ss:$12 sps:$4 sm:$0xff]   ;;  %v2344_v20 = vld [vmem:[#allocation7 + $0xac] ss:$12 sps:$4 sm:$0xff]   ;;  %v2351_v21 = vld [vmem:[#allocation7 + $0x68] ss:$12 sps:$4 sm:$0xff]  }
  0xe3   : > { %764 = vmatpush1.bf16.msra.mxu0 %v2328_v5  ;;  %v2343_v19 = vld [vmem:[#allocation7 + $0x90] ss:$12 sps:$4 sm:$0xff]   ;;  %v2346_v22 = vld [vmem:[#allocation7 + $0xa8] ss:$12 sps:$4 sm:$0xff]   ;;  %v2352_v24 = vld [vmem:[#allocation7 + $0x80] ss:$12 sps:$4 sm:$0xff]  }
  0xe4   : > { %765 = vmatprep.subr.bf16.mxu0 %v2329_v6  ;;  %v3083_v23 = vld [vmem:[%s3051_s22] sm:$0xff]  ;;  %vm2697_vm0 = vmmov 0   ;;  %v3099_v29 = vshrl.u32 %v618_v28, 7  ;;  %vm846_vm1 = vcmask 261120   ;;  %s2698_s9 = smov 96   ;;  %s2699_s26 = smov 64  }
  0xe5   : > { %2134 = vmatpush3.bf16.msra.mxu1 %v2348_v12  ;;  %v583_v25 = vpack.c.bf16 %v3083_v23, %v3083_v23  ;;  %v2353_v26 = vld [vmem:[#allocation7 + $0x98] ss:$12 sps:$4 sm:$0xff]   ;;  %v2354_v27 = vld [vmem:[#allocation7 + $0xb0] ss:$12 sps:$4 sm:$0xff]   ;;  %2147 = vmatprep.mubr.msk.bf16.mxu1 %vm2697_vm0, %v2696_v1  ;;  %s2700_s13 = smov 32   ;;  %vm909_vm2 = vcmask 1043456  }
  0xe6   : > { %2135 = vmatprep.subr.bf16.mxu1 %v2696_v1  ;;  %v624_v30 = vsub.s32 1, %v3099_v29  ;;  %v616_v31 = vld [vmem:[%s3274_s3] sm:$0x7]  ;;  %v620_v32 = vsub.s32 0, %v3099_v29  ;;  %v628_v44 = vsub.s32 2, %v3099_v29  ;;  %v845_v53 = vld [vmem:[%s3059_s7] sm:$0xff] }
  0xe7   : > { %766 = vmatpush1.bf16.msra.mxu0 %v2331_v7  ;;  %vm893_vm3 = vcmask 64512   ;;  %vm1305_vm4 = vcmask 523264   ;;  %vm1307_vm5 = vcmask 785408   ;;  %s3329_s0 = sld [smem:[#allocation23_spill]]  ;;  %s3332_s12 = sld [smem:[#allocation27_spill]] }
  0xe8   : > { %767 = vmatprep.subr.bf16.mxu0 %v2332_v8  ;;  %v625_v33 = vrot.slane %v616_v31, %v624_v30  ;;  %v621_v34 = vrot.slane %v616_v31, %v620_v32  ;;  %v629_v45 = vrot.slane %v616_v31, %v628_v44  ;;  %s3333_s4 = sld [smem:[#allocation28_spill]]  ;;  %s2071_s23 = sshll.u32 %s2798_s19, 7 }
  0xe9   : > { %2136 = vmatpush3.bf16.msra.mxu1 %v2349_v16  ;;  %v2018_v16 = vld [vmem:[%s3059_s7 + $0x10] sm:$0xff]  ;;  %s580_s22 = scalar_lea.vmem [#allocation13], %s1982_s14  ;;  %s1825_s28 = scalar_lea.sflag [#allocation4], %s3045_s11 }
  0xea   : > { %2137 = vmatprep.subr.bf16.mxu1 %v2696_v1  ;;  %p3335_p13 = scmp.ne.s32.totalorder %s3315_s18, 0  ;;  %s2701_s19 = smov [#allocation13]  }
  0xeb   : > { %768 = vmatpush1.bf16.msra.mxu0 %v2334_v9  ;;  %s2603_s14 = sshll.u32 %s2701_s19, 4  ;;  %s2604_s14 = int_to_ptr.vmem [resolvable:$false] %s2603_s14 }
  0xec   : > { %769 = vmatprep.subr.bf16.mxu0 %v2335_v11 }
  0xed   : > { %2138 = vmatpush3.bf16.msra.mxu1 %v2350_v18 }
  0xee   : > { %2139 = vmatprep.subr.bf16.mxu1 %v2696_v1 }
  0xef   : > { %770 = vmatpush1.bf16.msra.mxu0 %v2337_v13 }
  0xf0   : > { %771 = vmatprep.subr.bf16.mxu0 %v2338_v14 }
  0xf1   : > { %2140 = vmatpush3.bf16.msra.mxu1 %v2351_v21 }
  0xf2   : > { %2141 = vmatprep.subr.bf16.mxu1 %v2696_v1 }
  0xf3   : > { %772 = vmatpush1.bf16.msra.mxu0 %v2340_v15 }
  0xf4   : > { %773 = vmatprep.subr.bf16.mxu0 %v2341_v17 }
  0xf5   : > { %2142 = vmatpush3.bf16.msra.mxu1 %v2352_v24 }
  0xf6   : > { %2143 = vmatprep.subr.bf16.mxu1 %v2696_v1 }
  0xf7   : > { %774 = vmatpush1.bf16.msra.mxu0 %v2343_v19 }
  0xf8   : > { %775 = vmatprep.subr.bf16.mxu0 %v2344_v20 }
  0xf9   : > { %2144 = vmatpush3.bf16.msra.mxu1 %v2353_v26 }
  0xfa   : > { %2145 = vmatprep.subr.bf16.mxu1 %v2696_v1 }
  0xfb   : > { %776 = vmatpush1.bf16.msra.mxu0 %v2346_v22 }
  0xfc   : > { %2175 = vmatprep.subr.bf16.mxu0 %v2696_v1 }
  0xfd   : > { %2146 = vmatpush3.bf16.msra.mxu1 %v2354_v27 }
  0xfe   : > { %794 = vmatmul.mubr.bf16.vlgmr.msra.gmra.mrb[0].mxu0 %v583_v25  ;;  %2151 = vmatprep.subr.bf16.mxu1 %v2696_v1 }
  0xff   : > { %2177 = vmatprep.mubr.msk.bf16.mxu0 %vm2697_vm0, %v2696_v1 }
 0x100   : > { %2148 = vmatmul.mubr.bf16.vlgmr.msra.gmra.mrb[0].mxu1 %v583_v25 }
 0x101   : > { %2153 = vmatprep.mubr.msk.bf16.mxu1 %vm2697_vm0, %v2696_v1 }
 0x1d1   : > { %v795_v35 = vpop.f32.mrb[0].mxu0 }
 0x1d2   : > { %v797_v36 = vpop.f32.mrb[1].mxu0  ;;  %v796_v40 = vadd.f32 %v795_v35, %v621_v34  ;;  %v2021_v35 = vld [vmem:[%s3059_s7 + $0x18] sm:$0xff] }
 0x1d3   : > { %v798_v37 = vadd.f32 %v797_v36, %v625_v33  ;;  %v799_v38 = vpop.f32.mrb[2].mxu0  ;;  %v836_v46 = vpop.f32.mrb[0].mxu1  ;;  %v2015_v33 = vld [vmem:[%s3059_s7 + $0x8] sm:$0xff]  ;;  %s3330_s7 = sld [smem:[#allocation25_spill]] }
 0x1d4   : > { %v800_v39 = vpop.f32.mrb[3].mxu0  ;;  %v842_v43 = vpack.c.bf16 %v796_v40, %v796_v40  ;;  %v837_v47 = vadd.f32 %v836_v46, %v629_v45  ;;  %v2149_v48 = vpop.f32.mrb[1].mxu1 }
 0x1d5   : > { %v843_v41 = vpack.c.bf16 %v798_v37, %v798_v37  ;;  %v839_v49 = vpop.f32.mrb[2].mxu1 }
 0x1d6   : > { %v3121_v50 = vpack.c.bf16 %v837_v47, %v837_v47  ;;  %v2150_v51 = vpop.f32.mrb[3].mxu1 }
 0x1d7   : > { %959 = vrot.lane.b32.xlu1 %v843_v41, %s2698_s9  ;;  %v851_v42 = vsel %vm846_vm1, %v843_v41, 0 }
 0x1d8   : > { %2152 = vmatpush3.bf16.xpose.msra.mxu1 %v851_v42  ;;  %v911_v52 = vsel %vm909_vm2, %v3121_v50, 0 }
 0x1d9   : > { %2157 = vmatprep.subr.bf16.mxu1 %v2696_v1 }
 0x1db   : > { %956 = vrot.lane.b32.xlu1 %v842_v43, %s2698_s9 }
 0x1df   : > { %1070 = vrot.lane.b32.xlu1 %v842_v43, %s2699_s26  ;;  %2154 = vmatmul.mubr.msk.bf16.vlgmr.msra.gmra.mrb[4].mxu1 %vm846_vm1, %v842_v43 }
 0x1e0   : > { %2159 = vmatprep.mubr.msk.bf16.mxu1 %vm2697_vm0, %v2696_v1  ;;  %2158 = vmatpush3.bf16.msra.mxu1 %v911_v52 }
 0x1e1   : > { %2163 = vmatprep.subr.bf16.mxu1 %v2696_v1 }
 0x1e3   : > { %1184 = vrot.lane.b32.xlu1 %v843_v41, %s2700_s13 }
 0x1e7   : > { %1182 = vrot.lane.b32.xlu1 %v842_v43, %s2700_s13 }
 0x249   : > { %v960_v3 = vpop.permute.xlu1 %959 }
 0x24a   : > { %v965_v14 = vsel %vm846_vm1, %v960_v3, 0 }
 0x24d   : > { %v957_v4 = vpop.permute.xlu1 %956 }
 0x251   : > { %v1071_v6 = vpop.permute.xlu1 %1070 }
 0x255   : > { %v1185_v9 = vpop.permute.xlu1 %1184 }
 0x256   : > { %v1190_v12 = vsel %vm846_vm1, %v1185_v9, 0 }
 0x259   : > { %v1183_v15 = vpop.permute.xlu1 %1182 }
 0x2b2   : > { %v887_v54 = vpop.f32.mrb[4].mxu1 }
 0x2b3   : > { %v888_v55 = vadd.f32 %v887_v54, %v845_v53  ;;  %v2155_v56 = vpop.f32.mrb[5].mxu1 }
 0x2b4   : > { %v890_v57 = vpop.f32.mrb[6].mxu1 }
 0x2b5   : > { %v2156_v58 = vpop.f32.mrb[7].mxu1  ;;  %v894_v59 = vsel %vm893_vm3, %v888_v55, -inf }
 0x2b6   : > { %895 = vmax.xlane.f32.xlu0 %v894_v59 }
 0x343   : > { %v896_v60 = vpop.xlane.xlu0 %895 }
 0x344   : > { %v897_v61 = vsub.f32 %v888_v55, %v896_v60 }
 0x346   : > { %v898_v62 = vmul.f32 1.442695, %v897_v61 }
 0x348   : > { %2403 = vpow2.f32 %v898_v62 }
 0x352   : > { %v2404_v63 = vpop.eup %2403 }
 0x353   : > { %v900_v2 = vsel %vm893_vm3, %v2404_v63, 0.0 }
 0x354   : > { %901 = vadd.xlane.f32.xlu0 %v900_v2 }
 0x36a   : > { %1072 = vrot.lane.b32.xlu0 %v843_v41, %s2699_s26 }
 0x3e1   : > { %v902_v5 = vpop.xlane.xlu0 %901 }
 0x3e2   : > { %2405 = vrcp.f32 %v902_v5 }
 0x3e5   : > { %v1073_v7 = vpop.permute.xlu0 %1072 }
 0x3e6   : > { %v1078_v8 = vsel %vm846_vm1, %v1073_v7, 0 }
 0x3e7   : > { %2176 = vmatpush3.bf16.xpose.msra.mxu0 %v1078_v8 }
 0x3e8   : > { %2187 = vmatprep.subr.bf16.mxu0 %v2696_v1 }
 0x3ec   : > { %v2406_v10 = vpop.eup %2405 }
 0x3ed   : > { %v904_v11 = vmul.f32 %v2406_v10, %v2404_v63 }
 0x3ee   : > { %2178 = vmatmul.mubr.msk.bf16.vlgmr.msra.gmra.mrb[4].mxu0 %vm846_vm1, %v1071_v6 }
 0x3ef   : > { %2188 = vmatpush3.bf16.xpose.msra.mxu0 %v1190_v12  ;;  %v905_v13 = vpack.c.bf16 %v904_v11, %v904_v11  ;;  %2189 = vmatprep.mubr.msk.bf16.mxu0 %vm2697_vm0, %v2696_v1 }
 0x3f0   : > { %2199 = vmatprep.subr.bf16.mxu0 %v2696_v1 }
 0x3f1   : > { %2160 = vmatmul.mubr.msk.bf16.vlgmr.msra.gmra.mrb[8].mxu1 %vm893_vm3, %v905_v13 }
 0x3f2   : > { %2164 = vmatpush3.bf16.xpose.msra.mxu1 %v965_v14  ;;  %2165 = vmatprep.mubr.msk.bf16.mxu1 %vm2697_vm0, %v2696_v1 }
 0x3f3   : > { %2169 = vmatprep.subr.bf16.mxu1 %v2696_v1 }
 0x3f6   : > { %2190 = vmatmul.mubr.msk.bf16.vlgmr.msra.gmra.mrb[8].mxu0 %vm846_vm1, %v1183_v15 }
 0x3f7   : > { %2215 = vmatprep.mubr.msk.bf16.mxu0 %vm2697_vm0, %v2696_v1 }
 0x3f9   : > { %2166 = vmatmul.mubr.msk.bf16.vlgmr.msra.gmra.mrb[12].mxu1 %vm846_vm1, %v957_v4 }
 0x3fa   : > { %2171 = vmatprep.mubr.msk.bf16.mxu1 %vm2697_vm0, %v2696_v1 }
 0x4c1   : > { %v1114_v17 = vpop.f32.mrb[4].mxu0 }
 0x4c2   : > { %v1115_v18 = vadd.f32 %v2018_v16, %v1114_v17  ;;  %v2179_v19 = vpop.f32.mrb[5].mxu0  ;;  %v2355_v16 = vld [vmem:[#allocation8] sm:$0xff]   ;;  %v2356_v17 = vld [vmem:[#allocation8 + $0x8] sm:$0xff]  }
 0x4c3   : > { %v1117_v20 = vpop.f32.mrb[6].mxu0  ;;  %2200 = vmatpush3.bf16.msra.mxu0 %v2355_v16  ;;  %v2358_v19 = vld [vmem:[#allocation8 + $0x18] sm:$0xff]  }
 0x4c4   : > { %v3149_v21 = vpop.f32.mrb[8].mxu1  ;;  %v2180_v22 = vpop.f32.mrb[7].mxu0  ;;  %v1120_v24 = vsel %vm893_vm3, %v1115_v18, -inf  ;;  %2201 = vmatprep.subr.bf16.mxu0 %v2696_v1  ;;  %v2359_v20 = vld [vmem:[#allocation8 + $0x20] sm:$0xff]  }
 0x4c5   : > { %1121 = vmax.xlane.f32.xlu0 %v1120_v24  ;;  %v2161_v25 = vpop.f32.mrb[9].mxu1  ;;  %v2361_v22 = vld [vmem:[#allocation8 + $0x30] sm:$0xff]  }
 0x4c6   : > { %v950_v26 = vpop.f32.mrb[10].mxu1 }
 0x4c7   : > { %v2162_v27 = vpop.f32.mrb[11].mxu1  ;;  %2202 = vmatpush3.bf16.msra.mxu0 %v2356_v17 }
 0x4c8   : > { %2203 = vmatprep.subr.bf16.mxu0 %v2696_v1 }
 0x4c9   : > { %v1226_v28 = vpop.f32.mrb[8].mxu0 }
 0x4ca   : > { %v2191_v31 = vpop.f32.mrb[9].mxu0  ;;  %v1227_v41 = vadd.f32 %v2021_v35, %v1226_v28  ;;  %v2362_v28 = vld [vmem:[#allocation8 + $0x38] sm:$0xff]  }
 0x4cb   : > { %v1229_v34 = vpop.f32.mrb[10].mxu0 }
 0x4cc   : > { %v1001_v36 = vpop.f32.mrb[12].mxu1  ;;  %v2192_v37 = vpop.f32.mrb[11].mxu0  ;;  %v1232_v44 = vsel %vm893_vm3, %v1227_v41, -inf }
 0x4cd   : > { %v1002_v38 = vadd.f32 %v2015_v33, %v1001_v36  ;;  %v2167_v39 = vpop.f32.mrb[13].mxu1 }
 0x4ce   : > { %v1004_v40 = vpop.f32.mrb[14].mxu1 }
 0x4cf   : > { %v2168_v42 = vpop.f32.mrb[15].mxu1  ;;  %v1007_v43 = vsel %vm893_vm3, %v1002_v38, -inf }
 0x4d0   : > { %1008 = vmax.xlane.f32.xlu1 %v1007_v43 }
 0x4d4   : > { %1233 = vmax.xlane.f32.xlu1 %v1232_v44 }
 0x552   : > { %v1122_v45 = vpop.xlane.xlu0 %1121 }
 0x553   : > { %v1123_v46 = vsub.f32 %v1115_v18, %v1122_v45  ;;  %v2357_v18 = vld [vmem:[#allocation8 + $0x10] sm:$0xff]  }
 0x554   : > { %2204 = vmatpush3.bf16.msra.mxu0 %v2357_v18 }
 0x555   : > { %v1124_v47 = vmul.f32 1.442695, %v1123_v46  ;;  %2205 = vmatprep.subr.bf16.mxu0 %v2696_v1  ;;  %v2024_v46 = vld [vmem:[%s3276_s5] ss:$0 sm:$0xff] }
 0x557   : > { %2407 = vpow2.f32 %v1124_v47 }
 0x558   : > { %2206 = vmatpush3.bf16.msra.mxu0 %v2358_v19  ;;  %v2387_v19 = vld [vmem:[#allocation11 + $0x40] sm:$0xff]  }
 0x559   : > { %2207 = vmatprep.subr.bf16.mxu0 %v2696_v1 }
 0x55c   : > { %2208 = vmatpush3.bf16.msra.mxu0 %v2359_v20  ;;  %v2388_v20 = vld [vmem:[#allocation11] sm:$0xff]  }
 0x55d   : > { %v1009_v48 = vpop.xlane.xlu1 %1008  ;;  %2209 = vmatprep.subr.bf16.mxu0 %v2696_v1 }
 0x55e   : > { %v1010_v49 = vsub.f32 %v1002_v38, %v1009_v48 }
 0x560   : > { %v1011_v55 = vmul.f32 1.442695, %v1010_v49 }
 0x561   : > { %v2408_v51 = vpop.eup %2407  ;;  %v1234_v52 = vpop.xlane.xlu1 %1233 }
 0x562   : > { %v1235_v53 = vsub.f32 %v1227_v41, %v1234_v52  ;;  %v1126_v54 = vsel %vm893_vm3, %v2408_v51, 0.0 }
 0x563   : > { %1127 = vadd.xlane.f32.xlu0 %v1126_v54  ;;  %v2363_v54 = vld [vmem:[#allocation10] ss:$8 sps:$4 sm:$0xff]  }
 0x564   : > { %v1236_v56 = vmul.f32 1.442695, %v1235_v53 }
 0x566   : > { %2409 = vpow2.f32 %v1236_v56  ;;  %v2366_v56 = vld [vmem:[#allocation10 + $0x10] ss:$8 sps:$4 sm:$0xff]  }
 0x567   : > { %2411 = vpow2.f32 %v1011_v55  ;;  %v2365_v55 = vld [vmem:[#allocation10 + $0x4] ss:$8 sps:$4 sm:$0xff]  }
 0x570   : > { %v2410_v57 = vpop.eup %2409 }
 0x571   : > { %v1238_v58 = vsel %vm893_vm3, %v2410_v57, 0.0  ;;  %v2412_v59 = vpop.eup %2411 }
 0x572   : > { %1239 = vadd.xlane.f32.xlu1 %v1238_v58  ;;  %v1013_v60 = vsel %vm893_vm3, %v2412_v59, 0.0  ;;  %v2369_v58 = vld [vmem:[#allocation10 + $0x20] ss:$8 sps:$4 sm:$0xff]  }
 0x576   : > { %1014 = vadd.xlane.f32.xlu1 %v1013_v60 }
 0x579   : > { %1020 = vrot.lane.b32.xlu0 %v3121_v50, %s2698_s9 }
 0x587   : > { %1132 = vrot.lane.b32.xlu1 %v3121_v50, %s2699_s26 }
 0x58b   : > { %1244 = vrot.lane.b32.xlu1 %v3121_v50, %s2700_s13 }
 0x5f0   : > { %v1128_v61 = vpop.xlane.xlu0 %1127 }
 0x5f4   : > { %v1021_v62 = vpop.permute.xlu0 %1020 }
 0x5f5   : > { %v1026_v63 = vsel %vm909_vm2, %v1021_v62, 0 }
 0x5f6   : > { %2170 = vmatpush3.bf16.msra.mxu1 %v1026_v63  ;;  %v2374_v63 = vld [vmem:[#allocation10 + $0x34] ss:$8 sps:$4 sm:$0xff]  }
 0x5f7   : > { %2181 = vmatprep.subr.bf16.mxu1 %v2696_v1 }
 0x5ff   : > { %v1240_v2 = vpop.xlane.xlu1 %1239 }
 0x603   : > { %v1015_v3 = vpop.xlane.xlu1 %1014 }
 0x604   : > { %2413 = vrcp.f32 %v1015_v3  ;;  %v2375_v3 = vld [vmem:[#allocation10 + $0x40] ss:$8 sps:$4 sm:$0xff]  }
 0x605   : > { %2415 = vrcp.f32 %v1128_v61 }
 0x606   : > { %2417 = vrcp.f32 %v1240_v2  ;;  %v2377_v2 = vld [vmem:[#allocation10 + $0x44] ss:$8 sps:$4 sm:$0xff]  }
 0x607   : > { %v1133_v6 = vpop.permute.xlu1 %1132 }
 0x608   : > { %v1138_v9 = vsel %vm909_vm2, %v1133_v6, 0  ;;  %v2383_v6 = vld [vmem:[#allocation10 + $0x64] ss:$8 sps:$4 sm:$0xff]  }
 0x60b   : > { %v1245_v10 = vpop.permute.xlu1 %1244 }
 0x60c   : > { %v1250_v13 = vsel %vm909_vm2, %v1245_v10, 0 }
 0x60e   : > { %v2414_v4 = vpop.eup %2413 }
 0x60f   : > { %v1017_v5 = vmul.f32 %v2414_v4, %v2412_v59  ;;  %v2416_v8 = vpop.eup %2415  ;;  %v2380_v4 = vld [vmem:[#allocation10 + $0x54] ss:$8 sps:$4 sm:$0xff]  }
 0x610   : > { %v1130_v50 = vmul.f32 %v2416_v8, %v2408_v51  ;;  %v2418_v12 = vpop.eup %2417  ;;  %v2386_v8 = vld [vmem:[#allocation10 + $0x74] ss:$8 sps:$4 sm:$0xff]  }
 0x611   : > { %v1018_v7 = vpack.c.bf16 %v1017_v5, %v1017_v5  ;;  %v1242_v14 = vmul.f32 %v2418_v12, %v2410_v57  ;;  %v2371_v57 = vld [vmem:[#allocation10 + $0x24] ss:$8 sps:$4 sm:$0xff]   ;;  %v2378_v5 = vld [vmem:[#allocation10 + $0x50] ss:$8 sps:$4 sm:$0xff]  }
 0x612   : > { %v1131_v11 = vpack.c.bf16 %v1130_v50, %v1130_v50 }
 0x613   : > { %2172 = vmatmul.mubr.msk.bf16.vlgmr.msra.gmra.mrb[16].mxu1 %vm893_vm3, %v1018_v7  ;;  %v1243_v15 = vpack.c.bf16 %v1242_v14, %v1242_v14  ;;  %v2381_v7 = vld [vmem:[#allocation10 + $0x60] ss:$8 sps:$4 sm:$0xff]  }
 0x614   : > { %2182 = vmatpush3.bf16.msra.mxu1 %v1138_v9  ;;  %2183 = vmatprep.mubr.msk.bf16.mxu1 %vm2697_vm0, %v2696_v1  ;;  %v2384_v9 = vld [vmem:[#allocation10 + $0x70] ss:$8 sps:$4 sm:$0xff]  }
 0x615   : > { %2193 = vmatprep.subr.bf16.mxu1 %v2696_v1 }
 0x61b   : > { %2184 = vmatmul.mubr.msk.bf16.vlgmr.msra.gmra.mrb[20].mxu1 %vm893_vm3, %v1131_v11 }
 0x61c   : > { %2194 = vmatpush3.bf16.msra.mxu1 %v1250_v13  ;;  %2195 = vmatprep.mubr.msk.bf16.mxu1 %vm2697_vm0, %v2696_v1  ;;  %v2033_v13 = vld [vmem:[%s3277_s6] ss:$0 sm:$0xff] }
 0x61d   : > { %1559 = vmatprep.subr.bf16.mxu1 %v2365_v55 }
 0x623   : > { %2196 = vmatmul.mubr.msk.bf16.vlgmr.msra.gmra.mrb[24].mxu1 %vm893_vm3, %v1243_v15  ;;  %v2034_v15 = vld [vmem:[%s3329_s0] ss:$0 sm:$0xff]  ;;  %s1838_s0 = sshll.u32 %s580_s22, 4  ;;  %s3229_s0 = int_to_ptr.vmem [resolvable:$true] %s1838_s0 }
 0x624   : > { %1591 = vmatprep.mubr.bf16.mxu1 %v2695_v0  ;;  %v2360_v0 = vld [vmem:[#allocation8 + $0x28] sm:$0xff]   ;;  %1560 = vmatpush1.bf16.msra.mxu1 %v2363_v54  ;;  %p2606_p0 = scmp.lt.s32.totalorder %s3229_s0, %s2604_s14 }
 0x625   : > { %2210 = vmatpush3.bf16.msra.mxu0 %v2360_v0  ;;  %v2389_v0 = vld [vmem:[#allocation11 + $0x48] sm:$0xff]  }
 0x626   : > { %2211 = vmatprep.subr.bf16.mxu0 %v2696_v1 }
 0x629   : > { %2212 = vmatpush3.bf16.msra.mxu0 %v2361_v22  ;;  %v2390_v22 = vld [vmem:[#allocation11 + $0x8] sm:$0xff]  }
 0x62a   : > { %2213 = vmatprep.subr.bf16.mxu0 %v2696_v1 }
 0x62d   : > { %2214 = vmatpush3.bf16.msra.mxu0 %v2362_v28  ;;  %v2395_v28 = vld [vmem:[#allocation11 + $0x60] sm:$0xff]  }
 0x62e   : > { %2109 = vmatprep.subr.bf16.mxu0 %v2387_v19 }
 0x6e6   : > { %v1062_v24 = vpop.f32.mrb[16].mxu1 }
 0x6e7   : > { %1293 = vrot.lane.b32.xlu0 %v1062_v24, %s2700_s13  ;;  %v2173_v25 = vpop.f32.mrb[17].mxu1  ;;  %v2391_v24 = vld [vmem:[#allocation11 + $0x50] sm:$0xff]  }
 0x6e8   : > { %v1065_v26 = vpop.f32.mrb[18].mxu1  ;;  %v2392_v25 = vld [vmem:[#allocation11 + $0x10] sm:$0xff]  }
 0x6e9   : > { %v2174_v27 = vpop.f32.mrb[19].mxu1  ;;  %v2393_v26 = vld [vmem:[#allocation11 + $0x58] sm:$0xff]  }
 0x6ea   : > { %v2394_v27 = vld [vmem:[#allocation11 + $0x18] sm:$0xff]  }
 0x6ee   : > { %v1174_v31 = vpop.f32.mrb[20].mxu1 }
 0x6ef   : > { %1297 = vrot.lane.b32.xlu1 %v1174_v31, %s2699_s26  ;;  %v2185_v33 = vpop.f32.mrb[21].mxu1  ;;  %v2396_v31 = vld [vmem:[#allocation11 + $0x20] sm:$0xff]   ;;  %s2605_s26 = scalar_lea.vmem %s2604_s14, 256 }
 0x6f0   : > { %v1177_v34 = vpop.f32.mrb[22].mxu1  ;;  %v2397_v33 = vld [vmem:[#allocation11 + $0x68] sm:$0xff]  }
 0x6f1   : > { %v2186_v35 = vpop.f32.mrb[23].mxu1  ;;  %v2398_v34 = vld [vmem:[#allocation11 + $0x28] sm:$0xff]  }
 0x6f2   : > { %v2399_v35 = vld [vmem:[#allocation11 + $0x70] sm:$0xff]  }
 0x6f6   : > { %v1286_v36 = vpop.f32.mrb[24].mxu1 }
 0x6f7   : > { %1301 = vrot.lane.b32.xlu0 %v1286_v36, %s2698_s9  ;;  %v2197_v37 = vpop.f32.mrb[25].mxu1  ;;  %v2400_v36 = vld [vmem:[#allocation11 + $0x30] sm:$0xff]   ;;  %s3331_s9 = sld [smem:[#allocation26_spill]] }
 0x6f8   : > { %v1289_v38 = vpop.f32.mrb[26].mxu1  ;;  %v2401_v37 = vld [vmem:[#allocation11 + $0x78] sm:$0xff]  }
 0x6f9   : > { %v2198_v39 = vpop.f32.mrb[27].mxu1  ;;  %v2402_v38 = vld [vmem:[#allocation11 + $0x38] sm:$0xff]  }
 0x6fa   : > { %v1467_v39 = vld [vmem:[%s3330_s7] sm:$0x3]  ;;  %s3334_s7 = sld [smem:[#allocation29_spill]] }
 0x700   : > { %s3227_s27 = scalar_lea.hbm %s3334_s7, %s2071_s23 }
 0x759   : > { %v1294_v40 = vpop.permute.xlu0 %1293 }
 0x75a   : > { %v1304_v1 = vsel %vm846_vm1, %v3149_v21, %v1294_v40  ;;  %v2368_v21 = vld [vmem:[#allocation10 + $0x14] ss:$8 sps:$4 sm:$0xff]   ;;  %v1472_v40 = vrot.slane %v1467_v39, %v620_v32 }
 0x75b   : > { %1561 = vmatprep.subr.bf16.mxu1 %v2368_v21 }
 0x75c   : > { %1562 = vmatpush1.bf16.msra.mxu1 %v2366_v56 }
 0x75d   : > { %1563 = vmatprep.subr.bf16.mxu1 %v2371_v57 }
 0x760   : > { %1564 = vmatpush1.bf16.msra.mxu1 %v2369_v58 }
 0x761   : > { %v1298_v41 = vpop.permute.xlu1 %1297  ;;  %1565 = vmatprep.subr.bf16.mxu1 %v2374_v63 }
 0x762   : > { %v1306_v42 = vsel %vm1305_vm4, %v1304_v1, %v1298_v41  ;;  %v1476_v41 = vrot.slane %v1467_v39, %v624_v30 }
 0x769   : > { %v1302_v43 = vpop.permute.xlu0 %1301 }
 0x76a   : > { %v1308_v44 = vsel %vm1307_vm5, %v1306_v42, %v1302_v43 }
 0x76b   : > { %v1309_v45 = vpack.c.bf16 %v1308_v44, %v1308_v44 }
 0x76d   : > { %2216 = vmatmul.mubr.bf16.vlgmr.msra.gmra.mrb[12].mxu0 %v1309_v45 }
 0x76e   : > { %2110 = vmatpush3.bf16.msra.mxu0 %v2388_v20 }
 0x76f   : > { %2111 = vmatprep.subr.bf16.mxu0 %v2389_v0 }
 0x772   : > { %2112 = vmatpush3.bf16.msra.mxu0 %v2390_v22 }
 0x773   : > { %2113 = vmatprep.subr.bf16.mxu0 %v2391_v24 }
 0x776   : > { %2114 = vmatpush3.bf16.msra.mxu0 %v2392_v25 }
 0x777   : > { %2115 = vmatprep.subr.bf16.mxu0 %v2393_v26 }
 0x77a   : > { %2116 = vmatpush3.bf16.msra.mxu0 %v2394_v27 }
 0x77b   : > { %2117 = vmatprep.subr.bf16.mxu0 %v2395_v28 }
 0x77e   : > { %2118 = vmatpush3.bf16.msra.mxu0 %v2396_v31 }
 0x77f   : > { %2119 = vmatprep.subr.bf16.mxu0 %v2397_v33 }
 0x782   : > { %2120 = vmatpush3.bf16.msra.mxu0 %v2398_v34 }
 0x783   : > { %2121 = vmatprep.subr.bf16.mxu0 %v2399_v35 }
 0x786   : > { %2122 = vmatpush3.bf16.msra.mxu0 %v2400_v36 }
 0x787   : > { %2123 = vmatprep.subr.bf16.mxu0 %v2401_v37 }
 0x78a   : > { %2124 = vmatpush3.bf16.msra.mxu0 %v2402_v38 }
 0x840   : > { %v1415_v47 = vpop.f32.mrb[12].mxu0 }
 0x841   : > { %v1416_v48 = vadd.f32 %v2024_v46, %v1415_v47  ;;  %v2217_v49 = vpop.f32.mrb[13].mxu0 }
 0x842   : > { %v1418_v51 = vpop.f32.mrb[14].mxu0 }
 0x843   : > { %v2218_v52 = vpop.f32.mrb[15].mxu0  ;;  %v1421_v53 = vadd.f32 %v1416_v48, %v3083_v23  ;;  %v2372_v23 = vld [vmem:[#allocation10 + $0x30] ss:$8 sps:$4 sm:$0xff]  }
 0x844   : > { %1566 = vmatpush1.bf16.msra.mxu1 %v2372_v23 }
 0x845   : > { %1422 = vadd.xlane.f32.xlu1 %v1421_v53  ;;  %1567 = vmatprep.subr.bf16.mxu1 %v2377_v2  ;;  %v2051_v2 = vld [vmem:[%s3331_s9] ss:$0 sm:$0xff]  ;;  %s2599_s9 = scalar_lea.vmem %s3229_s0, 128 }
 0x846   : > { %p2600_p6 = scmp.ne.s32.totalorder %s3229_s0, %s2599_s9  ;;  %p2607_p2 = scmp.lt.s32.totalorder %s2605_s26, %s2599_s9 }
 0x848   : > { %1568 = vmatpush1.bf16.msra.mxu1 %v2375_v3  ;;  %p2601_p7 = pnand %p2600_p6, %p3335_p13  ;;  %p2608_p5 = por %p2607_p2, %p2606_p0 }
 0x849   : > { %1569 = vmatprep.subr.bf16.mxu1 %v2380_v4 }
 0x84a   : > { %p2602_p9 = pneg %p2601_p7 }
 0x84c   : > { %1570 = vmatpush1.bf16.msra.mxu1 %v2378_v5  ;;  %p2609_p8 = pnand %p2608_p5, %p2602_p9 }
 0x84d   : > { %1571 = vmatprep.subr.bf16.mxu1 %v2383_v6 }
 0x850   : > { %1572 = vmatpush1.bf16.msra.mxu1 %v2381_v7 }
 0x851   : > { %1573 = vmatprep.subr.bf16.mxu1 %v2386_v8 }
 0x854   : > { %1574 = vmatpush1.bf16.msra.mxu1 %v2384_v9 }
 0x8d2   : > { %v1423_v59 = vpop.xlane.xlu1 %1422 }
 0x8d3   : > { %v1425_v60 = vmul.f32 0.0078125, %v1423_v59 }
 0x8d5   : > { %v1426_v61 = vsub.f32 %v1421_v53, %v1425_v60 }
 0x8d7   : > { %v1427_v62 = vmul.f32 %v1426_v61, %v1426_v61 }
 0x8d9   : > { %1428 = vadd.xlane.f32.xlu0 %v1427_v62 }
 0x966   : > { %v1429_v50 = vpop.xlane.xlu0 %1428 }
 0x967   : > { %v1430_v10 = vmul.f32 0.0078125, %v1429_v50 }
 0x969   : > { %v1431_v11 = vadd.f32 1e-05, %v1430_v10 }
 0x96b   : > { %2419 = vrsqrt.f32 %v1431_v11 }
 0x975   : > { %v2420_v12 = vpop.eup %2419 }
 0x976   : > { %v1433_v14 = vmul.f32 %v2420_v12, %v1426_v61 }
 0x978   : > { %v1441_v16 = vmul.f32 %v2033_v13, %v1433_v14 }
 0x97a   : > { %v3200_v17 = vadd.f32 %v2034_v15, %v1441_v16  ;;  %v2068_v16 = vld [vmem:[%s3332_s12] ss:$0 sm:$0xff] }
 0x97c   : > { %v1450_v18 = vpack.c.bf16 %v3200_v17, %v3200_v17 }
 0x97e   : > { %1592 = vmatmul.mubr.bf16.vlgmr.msra.gmra.mrb[28].mxu1 %v1450_v18 }
 0xa51   : > { %v1593_v1 = vpop.f32.mrb[28].mxu1 }
 0xa52   : > { %v1594_v42 = vadd.f32 %v1593_v1, %v1472_v40  ;;  %v1595_v43 = vpop.f32.mrb[29].mxu1 }
 0xa53   : > { %v1596_v44 = vadd.f32 %v1595_v43, %v1476_v41  ;;  %v1597_v45 = vpop.f32.mrb[30].mxu1 }
 0xa54   : > { %v1600_v46 = vmul.f32 %v1594_v42, %v1594_v42  ;;  %v1598_v47 = vpop.f32.mrb[31].mxu1 }
 0xa55   : > { %v1601_v48 = vmul.f32 %v1596_v44, %v1596_v44 }
 0xa56   : > { %v1602_v49 = vmul.f32 %v1600_v46, %v1594_v42 }
 0xa57   : > { %v1603_v51 = vmul.f32 %v1601_v48, %v1596_v44 }
 0xa58   : > { %v1604_v52 = vmul.f32 0.044715, %v1602_v49 }
 0xa59   : > { %v1605_v53 = vmul.f32 0.044715, %v1603_v51 }
 0xa5a   : > { %v1606_v54 = vadd.f32 %v1604_v52, %v1594_v42 }
 0xa5b   : > { %v1607_v55 = vadd.f32 %v1605_v53, %v1596_v44 }
 0xa5c   : > { %v1608_v21 = vmul.f32 0.7978846, %v1606_v54 }
 0xa5d   : > { %v1609_v56 = vmul.f32 0.7978846, %v1607_v55 }
 0xa5e   : > { %2421 = vtanh.f32 %v1608_v21 }
 0xa5f   : > { %2423 = vtanh.f32 %v1609_v56 }
 0xa68   : > { %v2422_v29 = vpop.eup %2421 }
 0xa69   : > { %v2424_v30 = vpop.eup %2423  ;;  %v1612_v32 = vadd.f32 1.0, %v2422_v29 }
 0xa6a   : > { %v1613_v57 = vadd.f32 1.0, %v2424_v30 }
 0xa6b   : > { %v1614_v58 = vmul.f32 0.5, %v1612_v32 }
 0xa6c   : > { %v1615_v59 = vmul.f32 0.5, %v1613_v57 }
 0xa6d   : > { %v1616_v60 = vmul.f32 %v1614_v58, %v1594_v42 }
 0xa6e   : > { %v1617_v61 = vmul.f32 %v1615_v59, %v1596_v44 }
 0xa6f   : > { %v1618_v63 = vpack.c.bf16 %v1616_v60, %v1616_v60 }
 0xa70   : > { %v1619_v62 = vpack.c.bf16 %v1617_v61, %v1617_v61 }
 0xa72   : > { %1787 = vmatprep.mubr.bf16.mxu0 %v1619_v62 }
 0xa73   : > { %1788 = vmatmul.mubr.bf16.vlgmr.msra.gmra.mrb[16].mxu0 %v1618_v63 }
 0xb46   : > { %v2125_v23 = vpop.f32.mrb[16].mxu0 }
 0xb47   : > { %v2126_v3 = vpop.f32.mrb[17].mxu0 }
 0xb48   : > { %v2127_v4 = vadd.f32 %v2126_v3, %v2125_v23  ;;  %v2128_v5 = vpop.f32.mrb[18].mxu0 }
 0xb49   : > { %v2129_v6 = vpop.f32.mrb[19].mxu0 }
 0xb4a   : > { %v1790_v7 = vadd.f32 %v2127_v4, %v2051_v2 }
 0xb4c   : > { %v1795_v8 = vadd.f32 %v1790_v7, %v3200_v17  ;;  %v2069_v17 = vld [vmem:[%s3333_s4] ss:$0 sm:$0xff] }
 0xb4e   : > { %1796 = vadd.xlane.f32.xlu0 %v1795_v8 }
 0xbdb   : > { %v1797_v9 = vpop.xlane.xlu0 %1796 }
 0xbdc   : > { %v1798_v50 = vmul.f32 0.0078125, %v1797_v9 }
 0xbde   : > { %v1799_v10 = vsub.f32 %v1795_v8, %v1798_v50 }
 0xbe0   : > { %v1800_v11 = vmul.f32 %v1799_v10, %v1799_v10 }
 0xbe2   : > { %1801 = vadd.xlane.f32.xlu1 %v1800_v11 }
 0xc6f   : > { %v1802_v12 = vpop.xlane.xlu1 %1801 }
 0xc70   : > { %v1803_v13 = vmul.f32 0.0078125, %v1802_v12 }
 0xc72   : > { %v1804_v14 = vadd.f32 1e-05, %v1803_v13 }
 0xc74   : > { %2425 = vrsqrt.f32 %v1804_v14 }
 0xc7e   : > { %v2426_v15 = vpop.eup %2425 }
 0xc7f   : > { %v1806_v18 = vmul.f32 %v2426_v15, %v1799_v10 }
 0xc81   : > { %v1814_v19 = vmul.f32 %v2068_v16, %v1806_v18 }
 0xc83   : > { %v1822_v20 = vadd.f32 %v2069_v17, %v1814_v19 }
 0xc85   : > { %1823 = vst [vmem:[%s580_s22] sm:$0xff] %v1822_v20 }
 0xc86   : > { %2612 = shalt.err (!%p2609_p8)
}
 0xc87   : > { %s2613_s11 = scalar_lea.hbm %s3227_s27, 128  ;;  %s2617_s2 = scalar_lea.hbm %s3334_s7, 256 }
 0xc88   : > { %p2614_p4 = scmp.ne.s32.totalorder %s3227_s27, %s2613_s11  ;;  %p2618_p1 = scmp.lt.u32.totalorder %s3227_s27, %s3334_s7 }
 0xc89   : > { %p2619_p11 = scmp.lt.u32.totalorder %s2617_s2, %s2613_s11  ;;  %p2621_p6 = scmp.lt.u32.totalorder %s2613_s11, %s3227_s27 }
 0xc8a   : > { %p2615_p3 = pnand %p2614_p4, %p3335_p13 }
 0xc8b   : > { %p2620_p12 = por %p2619_p11, %p2618_p1 }
 0xc8c   : > { %p2616_p10 = pneg %p2615_p3 }
 0xc8d   : > { %p2622_p7 = por %p2621_p6, %p2620_p12 }
 0xc8f   : > { %p2623_p9 = pnand %p2622_p7, %p2616_p10 }
 0xc91   : > { %2626 = shalt.err (!%p2623_p9)
}
 0xc92   : > { %2239 = dma.vmem_to_hbm [thread:$0]  (%p3335_p13), %s3229_s0, 128, %s3227_s27, %s1825_s28  }
 0xc93 PF: > { %s1850_s23 = sand.u32 1, %s2669_s29   ;;  %p3336_p0 = scmp.ne.s32.totalorder %s3316_s25, 0 }
 0xc94   : > { %p3337_p2 = scmp.ge.s32.totalorder %s2681_s16, 2  ;;  %s1851_s22 = scalar_lea.sflag [#allocation4], %s1850_s23 }
 0xc96   : > { %p2262_p5 = pnand %p3337_p2, %p3336_p0 }
 0xc98   : > { %2664 = dma.done.wait (!%p2262_p5), %s1851_s22, 128  }
 0xc99   : > { %2666 = vsyncadd (!%p2262_p5), %s1851_s22, 4294967168  ;;  %p32_p8 = scmp.ge.s32.totalorder %s2922_s21, 4   ;;  %s3338_s29 = smov %s2673_s30 }
 0xc9a   : > { %s3339_s30 = smov %s2677_s15  ;;  %s3340_s15 = smov %s2933_s17 }
 0xc9b   : > { %s3341_s16 = smov %s2922_s21  ;;  %34 = sbr.rel (!%p32_p8) target bundleno = 20 (0x14), region = 153 }
 0xca2   :  { %1856 = vsyncpa [#allocation3], 1 }
 0xca3   :  { %1858 = vsyncpa [#allocation3 + $0x1], 1 }
 0xca4   :  { %1859 = vsyncpa [#allocation6], 1 }
 0xca5   :  { %1861 = vsyncpa [#allocation6 + $0x1], 1 }
 0xca6   :  { %1862 = vsyncpa [#allocation9], 1 }
 0xca7   :  { %1863 = vsyncpa [#allocation12], 1 }
 0xca8   :  { %1864 = vsyncpa [#allocation4], 1 }
 0xca9   :  { %1866 = vsyncpa [#allocation4 + $0x1], 1 }

</bundles_post_ra>
